<compile_context>
chip_gen: v7x
topology: tpu7x:2x2x1
jax: 0.10.0
libtpu: 0.0.40
codegen_flags: <defaults>
</compile_context>

<pallas_src>
import functools
import math

import jax
import jax.numpy as jnp
from jax import lax
from jax.experimental import pallas as pl
from jax.experimental.pallas import tpu as pltpu

LN_EPS = 1e-5
COMPUTE_DTYPE = jnp.bfloat16          # matmul-operand / residual-stream dtype
VMEM_LIMIT = 64 * 1024 * 1024         # raise scoped VMEM above defaults


def _layernorm(v, g, b):
    mu = jnp.mean(v, axis=-1, keepdims=True)
    d = v - mu
    var = jnp.mean(d * d, axis=-1, keepdims=True)
    return d * lax.rsqrt(var + LN_EPS) * g + b


def _gelu(x):
    # GLM's jit-scripted tanh-approximation gelu.
    return x * 0.5 * (1.0 + jnp.tanh(0.7978845608028654 * x * (1.0 + 0.044715 * x * x)))


# ---------------------------------------------------------------------------
# Kernel 1: the whole GLM transformer stack.  grid = (batch, layer).
# The output block (one batch element's [S, H] residual stream) is VMEM-
# resident across the layer axis and acts as the carried state.
# ---------------------------------------------------------------------------
def _glm_stack_kernel(sep_ref, x_ref,
                      ln1g_ref, ln1b_ref, wqkv_ref, bqkv_ref, wd_ref, bd_ref,
                      ln2g_ref, ln2b_ref, w1_ref, b1_ref, w2_ref, b2_ref,
                      o_ref, *, num_heads):
    layer = pl.program_id(1)

    # Seed the carried residual stream from the embeddings at the first layer.
    @pl.when(layer == 0)
    def _():
        o_ref[...] = x_ref[...]

    x = o_ref[...].astype(jnp.float32)                     # [S, H] f32 math
    S, H = x.shape
    hd = H // num_heads
    inv_sqrt_hd = 1.0 / math.sqrt(hd)

    # GLM mask from scalar `sep`: lower triangular with the first `sep`
    # columns fully visible.  Cheap VPU work, recomputed per step.
    sep = sep_ref[0]
    row = lax.broadcasted_iota(jnp.int32, (S, S), 0)
    col = lax.broadcasted_iota(jnp.int32, (S, S), 1)
    allowed = jnp.logical_or(col <= row, col < sep)        # [S, S] bool

    # --- self attention (pre-LN) ---
    ln1 = _layernorm(x, ln1g_ref[...], ln1b_ref[...]).astype(COMPUTE_DTYPE)
    qkv = (jnp.dot(ln1, wqkv_ref[...], preferred_element_type=jnp.float32)
           + bqkv_ref[...])                                # [S, 3H] f32

    def heads(t):                                          # -> (num_heads, S, hd)
        return jnp.transpose(t.reshape(S, num_heads, hd), (1, 0, 2)).astype(COMPUTE_DTYPE)

    q3 = heads(qkv[:, :H])
    k3 = heads(qkv[:, H:2 * H])
    v3 = heads(qkv[:, 2 * H:])

    scores = jnp.einsum("hqd,hkd->hqk", q3, k3,
                        preferred_element_type=jnp.float32) * inv_sqrt_hd
    scores = jnp.where(allowed[None, :, :], scores, -10000.0)
    scores = scores - jnp.max(scores, axis=-1, keepdims=True)
    p = jnp.exp(scores)
    p = p * pl.reciprocal(jnp.sum(p, axis=-1, keepdims=True), approx=True)
    ctx3 = jnp.einsum("hqk,hkd->hqd", p.astype(COMPUTE_DTYPE), v3,
                      preferred_element_type=jnp.float32)  # [nh, S, hd]
    ctx = jnp.transpose(ctx3, (1, 0, 2)).reshape(S, H).astype(COMPUTE_DTYPE)

    attn_out = (jnp.dot(ctx, wd_ref[...], preferred_element_type=jnp.float32)
                + bd_ref[...])
    ln_input = x + attn_out                                # residual 1 (f32)

    # --- MLP (pre-LN) ---
    ln2 = _layernorm(ln_input, ln2g_ref[...], ln2b_ref[...]).astype(COMPUTE_DTYPE)
    h1 = jnp.dot(ln2, w1_ref[...], preferred_element_type=jnp.float32) + b1_ref[...]
    h1 = _gelu(h1).astype(COMPUTE_DTYPE)
    h2 = jnp.dot(h1, w2_ref[...], preferred_element_type=jnp.float32) + b2_ref[...]

    o_ref[...] = (ln_input + h2).astype(o_ref.dtype)       # residual 2 -> bf16


def glm_transformer_stack(x, sep, stacked, num_heads):
    """x: [B, S, H] bf16 embeddings; sep: int32[1] scalar-prefetch array;
    stacked: dict of layer params each with a leading num_layers axis."""
    B, S, H = x.shape
    names = ("ln1_g", "ln1_b", "w_qkv", "b_qkv", "w_dense", "b_dense",
             "ln2_g", "ln2_b", "w_h4h", "b_h4h", "w_4hh", "b_4hh")
    weights = [stacked[k] for k in names]
    L = stacked["w_qkv"].shape[0]

    def wspec(w):
        n_rest = w.ndim - 1
        return pl.BlockSpec((None,) + w.shape[1:],
                            lambda b, l, sep_ref, _n=n_rest: (l,) + (0,) * _n)

    in_specs = ([pl.BlockSpec((None, S, H), lambda b, l, sep_ref: (b, 0, 0))]
                + [wspec(w) for w in weights])

    # TODO(synk): at realistic S/H the attention should additionally be tiled
    # over the sequence (flash-style online softmax) and the MLP over its 4H
    # intermediate so per-layer weights/intermediates need not be VMEM-resident.
    grid_spec = pltpu.PrefetchScalarGridSpec(
        num_scalar_prefetch=1,
        grid=(B, L),
        in_specs=in_specs,
        out_specs=pl.BlockSpec((None, S, H), lambda b, l, sep_ref: (b, 0, 0)),
    )
    return pl.pallas_call(
        functools.partial(_glm_stack_kernel, num_heads=num_heads),
        out_shape=jax.ShapeDtypeStruct((B, S, H), x.dtype),
        grid_spec=grid_spec,
        compiler_params=pltpu.CompilerParams(
            dimension_semantics=("parallel", "arbitrary"),
            vmem_limit_bytes=VMEM_LIMIT),
    )(sep, x, *weights)


# ---------------------------------------------------------------------------
# Kernel 2: final layernorm fused with tied-embedding logits projection,
#           tiled over the vocabulary dimension.
# ---------------------------------------------------------------------------
def _logits_kernel(x_ref, g_ref, b_ref, emb_ref, o_ref, ln_scratch):
    # Compute the layernorm once per batch element (vocab tile 0) and reuse it
    # for every subsequent vocab tile via the persistent VMEM scratch.
    @pl.when(pl.program_id(1) == 0)
    def _():
        x = x_ref[0].astype(jnp.float32)                  # [S, H]
        ln_scratch[...] = _layernorm(x, g_ref[...], b_ref[...]).astype(ln_scratch.dtype)

    ln = ln_scratch[...]                                  # [S, H]  bf16
    emb = emb_ref[...]                                    # [tv, H] bf16
    # F.linear(ln, emb) == ln @ emb^T : contract hidden dims of both.
    logits = lax.dot_general(ln, emb, (((1,), (1,)), ((), ())),
                             preferred_element_type=jnp.float32)   # [S, tv]
    o_ref[0] = logits.astype(o_ref.dtype)


def final_ln_and_logits(x, g, b, emb_weight):
    B, S, H = x.shape
    V = emb_weight.shape[0]
    # lane-dense vocab tile (multiple of 128 when possible)
    tv = 512 if V % 512 == 0 else (128 if V % 128 == 0 else V)
    nv = V // tv
    return pl.pallas_call(
        _logits_kernel,
        out_shape=jax.ShapeDtypeStruct((B, S, V), jnp.float32),
        grid=(B, nv),
        in_specs=[
            pl.BlockSpec((1, S, H), lambda bb, vv: (bb, 0, 0)),
            pl.BlockSpec((1, H), lambda bb, vv: (0, 0)),
            pl.BlockSpec((1, H), lambda bb, vv: (0, 0)),
            pl.BlockSpec((tv, H), lambda bb, vv: (vv, 0)),
        ],
        out_specs=pl.BlockSpec((1, S, tv), lambda bb, vv: (bb, 0, vv)),
        scratch_shapes=[pltpu.VMEM((S, H), COMPUTE_DTYPE)],
        compiler_params=pltpu.CompilerParams(
            dimension_semantics=("parallel", "arbitrary"),
            vmem_limit_bytes=VMEM_LIMIT),
    )(x, g, b, emb_weight)


# ---------------------------------------------------------------------------
# Parameter initialization (deterministic, synthetic; matches module shapes).
# Layer weights are stacked along a leading num_layers axis.
# ---------------------------------------------------------------------------
def init_glm_params(key, num_layers, vocab_size, hidden_size, max_sequence_length):
    H = hidden_size
    L = num_layers
    std = 0.02
    keys = iter(jax.random.split(key, 8))

    def nrm(shape):
        return (jax.random.normal(next(keys), shape, jnp.float32) * std).astype(COMPUTE_DTYPE)

    params = {
        "word_embeddings": nrm((vocab_size, H)),
        "position_embeddings": nrm((max_sequence_length + 1, H)),
        "block_position_embeddings": nrm((max_sequence_length + 1, H)),
        "final_ln_g": jnp.ones((1, H), jnp.float32),
        "final_ln_b": jnp.zeros((1, H), jnp.float32),
        "layers": {
            "ln1_g": jnp.ones((L, 1, H), jnp.float32),
            "ln1_b": jnp.zeros((L, 1, H), jnp.float32),
            "w_qkv": nrm((L, H, 3 * H)),
            "b_qkv": jnp.zeros((L, 1, 3 * H), jnp.float32),
            "w_dense": nrm((L, H, H)),
            "b_dense": jnp.zeros((L, 1, H), jnp.float32),
            "ln2_g": jnp.ones((L, 1, H), jnp.float32),
            "ln2_b": jnp.zeros((L, 1, H), jnp.float32),
            "w_h4h": nrm((L, H, 4 * H)),
            "b_h4h": jnp.zeros((L, 1, 4 * H), jnp.float32),
            "w_4hh": nrm((L, 4 * H, H)),
            "b_4hh": jnp.zeros((L, 1, H), jnp.float32),
        },
    }
    return params


# ---------------------------------------------------------------------------
# Full GLMModel forward
# ---------------------------------------------------------------------------
def glm_forward(params, input_ids, position_ids, attention_mask_sep, num_heads):
    """attention_mask_sep: scalar int sep (GLM 'is_scalar' mask path)."""
    # TODO(synk): embedding gathers are data-dependent; done in plain JAX (a
    # rectangular BlockSpec cannot express the gather) and fused by XLA.
    words = jnp.take(params["word_embeddings"], input_ids, axis=0)               # [B,S,H]
    pos = jnp.take(params["position_embeddings"], position_ids[:, 0, :], axis=0)
    block_pos = jnp.take(params["block_position_embeddings"], position_ids[:, 1, :], axis=0)
    hidden = (words.astype(jnp.float32) + pos.astype(jnp.float32)
              + block_pos.astype(jnp.float32)).astype(COMPUTE_DTYPE)
    # embedding_dropout == identity in eval mode.

    sep = jnp.reshape(jnp.asarray(attention_mask_sep, jnp.int32), (1,))

    hidden = glm_transformer_stack(hidden, sep, params["layers"], num_heads)

    logits = final_ln_and_logits(hidden, params["final_ln_g"], params["final_ln_b"],
                                 params["word_embeddings"])
    # mems are empty (max_memory_length=0, return_memory=False) -> return (logits,)
    return (logits,)


if __name__ == "__main__":
    # Small, module-consistent shapes.
    num_layers = 2
    vocab_size = 128
    hidden_size = 32
    num_attention_heads = 2
    max_sequence_length = 16
    batch = 2
    seq = 8

    key = jax.random.PRNGKey(0)
    k_param, k_ids = jax.random.split(key)

    params = init_glm_params(k_param, num_layers, vocab_size, hidden_size,
                             max_sequence_length)

    input_ids = jax.random.randint(k_ids, (batch, seq), 0, vocab_size, dtype=jnp.int32)
    # position_ids[:, 0] = token positions, position_ids[:, 1] = block positions
    position_ids = jnp.stack(
        [jnp.broadcast_to(jnp.arange(seq, dtype=jnp.int32), (batch, seq)),
         jnp.zeros((batch, seq), jnp.int32)],
        axis=1)                                       # [B, 2, S]
    attention_mask_sep = jnp.int32(4)                 # GLM scalar 'sep' mask

    outputs = glm_forward(params, input_ids, position_ids, attention_mask_sep,
                          num_attention_heads)
    logits = jax.block_until_ready(outputs[0])
    assert logits.shape == (batch, seq, vocab_size)
    assert bool(jnp.all(jnp.isfinite(logits)))
    print("KERNEL_OK")
</pallas_src>

<mosaic_0001>
module attributes {stable_mosaic.version = 11 : i64} {
  func.func @_glm_stack_kernel(%arg0: i32, %arg1: i32, %arg2: memref<1xi32, #tpu.memory_space<smem>>, %arg3: memref<1x8x32xbf16, #tpu.memory_space<vmem>>, %arg4: memref<1x1x32xf32, #tpu.memory_space<vmem>>, %arg5: memref<1x1x32xf32, #tpu.memory_space<vmem>>, %arg6: memref<1x32x96xbf16, #tpu.memory_space<vmem>>, %arg7: memref<1x1x96xf32, #tpu.memory_space<vmem>>, %arg8: memref<1x32x32xbf16, #tpu.memory_space<vmem>>, %arg9: memref<1x1x32xf32, #tpu.memory_space<vmem>>, %arg10: memref<1x1x32xf32, #tpu.memory_space<vmem>>, %arg11: memref<1x1x32xf32, #tpu.memory_space<vmem>>, %arg12: memref<1x32x128xbf16, #tpu.memory_space<vmem>>, %arg13: memref<1x1x128xf32, #tpu.memory_space<vmem>>, %arg14: memref<1x128x32xbf16, #tpu.memory_space<vmem>>, %arg15: memref<1x1x32xf32, #tpu.memory_space<vmem>>, %arg16: memref<1x8x32xbf16, #tpu.memory_space<vmem>>) attributes {dimension_semantics = [#tpu.dimension_semantics<parallel>, #tpu.dimension_semantics<arbitrary>], iteration_bounds = array<i64: 2, 2>, scalar_prefetch = 1 : i64, scratch_operands = 0 : i64, tpu.core_type = #tpu.core_type<tc>, window_params = [{transform_indices = @transform_0, window_bounds = array<i64: 1, 8, 32>}, {transform_indices = @transform_1, window_bounds = array<i64: 1, 1, 32>}, {transform_indices = @transform_2, window_bounds = array<i64: 1, 1, 32>}, {transform_indices = @transform_3, window_bounds = array<i64: 1, 32, 96>}, {transform_indices = @transform_4, window_bounds = array<i64: 1, 1, 96>}, {transform_indices = @transform_5, window_bounds = array<i64: 1, 32, 32>}, {transform_indices = @transform_6, window_bounds = array<i64: 1, 1, 32>}, {transform_indices = @transform_7, window_bounds = array<i64: 1, 1, 32>}, {transform_indices = @transform_8, window_bounds = array<i64: 1, 1, 32>}, {transform_indices = @transform_9, window_bounds = array<i64: 1, 32, 128>}, {transform_indices = @transform_10, window_bounds = array<i64: 1, 1, 128>}, {transform_indices = @transform_11, window_bounds = array<i64: 1, 128, 32>}, {transform_indices = @transform_12, window_bounds = array<i64: 1, 1, 32>}, {transform_indices = @transform_13, window_bounds = array<i64: 1, 8, 32>}]} {
    %c0_i32 = arith.constant 0 : i32
    %0 = arith.cmpi eq, %arg1, %c0_i32 : i32
    %1 = arith.extui %0 : i1 to i32
    %c0_i32_0 = arith.constant 0 : i32
    %2 = arith.cmpi ne, %1, %c0_i32_0 : i32
    scf.if %2 {
      %c0_67 = arith.constant 0 : index
      %c0_68 = arith.constant 0 : index
      %c0_69 = arith.constant 0 : index
      %147 = vector.load %arg3[%c0_67, %c0_68, %c0_69] : memref<1x8x32xbf16, #tpu.memory_space<vmem>>, vector<1x8x32xbf16>
      %148 = vector.shape_cast %147 : vector<1x8x32xbf16> to vector<8x32xbf16>
      %c0_70 = arith.constant 0 : index
      %c0_71 = arith.constant 0 : index
      %c0_72 = arith.constant 0 : index
      %149 = vector.load %arg16[%c0_70, %c0_71, %c0_72] : memref<1x8x32xbf16, #tpu.memory_space<vmem>>, vector<1x8x32xbf16>
      %150 = vector.shape_cast %149 : vector<1x8x32xbf16> to vector<8x32xbf16>
      %151 = vector.shape_cast %148 : vector<8x32xbf16> to vector<1x8x32xbf16>
      tpu.vector_store %arg16[%c0_70, %c0_71, %c0_72], %151 {strides = array<i32>} : memref<1x8x32xbf16, #tpu.memory_space<vmem>>, vector<1x8x32xbf16>,
    } else {
    }
    %c0 = arith.constant 0 : index
    %c0_1 = arith.constant 0 : index
    %c0_2 = arith.constant 0 : index
    %3 = vector.load %arg16[%c0, %c0_1, %c0_2] : memref<1x8x32xbf16, #tpu.memory_space<vmem>>, vector<1x8x32xbf16>
    %4 = vector.shape_cast %3 : vector<1x8x32xbf16> to vector<8x32xbf16>
    %5 = arith.extf %4 : vector<8x32xbf16> to vector<8x32xf32>
    %c0_3 = arith.constant 0 : index
    %6 = memref.load %arg2[%c0_3] : memref<1xi32, #tpu.memory_space<smem>>
    %7 = tpu.iota {dimensions = array<i32: 0>} : vector<8x8xi32>
    %8 = tpu.iota {dimensions = array<i32: 1>} : vector<8x8xi32>
    %9 = arith.cmpi sle, %8, %7 : vector<8x8xi32>
    %10 = vector.broadcast %6 : i32 to vector<8x8xi32>
    %11 = arith.cmpi slt, %8, %10 : vector<8x8xi32>
    %12 = arith.ori %9, %11 : vector<8x8xi1>
    %c0_4 = arith.constant 0 : index
    %c0_5 = arith.constant 0 : index
    %c0_6 = arith.constant 0 : index
    %13 = vector.load %arg4[%c0_4, %c0_5, %c0_6] : memref<1x1x32xf32, #tpu.memory_space<vmem>>, vector<1x1x32xf32>
    %14 = vector.shape_cast %13 : vector<1x1x32xf32> to vector<1x32xf32>
    %c0_7 = arith.constant 0 : index
    %c0_8 = arith.constant 0 : index
    %c0_9 = arith.constant 0 : index
    %15 = vector.load %arg5[%c0_7, %c0_8, %c0_9] : memref<1x1x32xf32, #tpu.memory_space<vmem>>, vector<1x1x32xf32>
    %16 = vector.shape_cast %15 : vector<1x1x32xf32> to vector<1x32xf32>
    %cst = arith.constant dense<0.000000e+00> : vector<8xf32>
    %17 = vector.multi_reduction <add>, %5, %cst [1] : vector<8x32xf32> to vector<8xf32>
    %18 = vector.shape_cast %17 : vector<8xf32> to vector<8x1xf32>
    %cst_10 = arith.constant 3.200000e+01 : f32
    %19 = vector.broadcast %cst_10 : f32 to vector<8x1xf32>
    %20 = arith.divf %18, %19 : vector<8x1xf32>
    %21 = vector.broadcast %20 : vector<8x1xf32> to vector<8x32xf32>
    %22 = arith.subf %5, %21 : vector<8x32xf32>
    %23 = arith.mulf %22, %22 : vector<8x32xf32>
    %cst_11 = arith.constant dense<0.000000e+00> : vector<8xf32>
    %24 = vector.multi_reduction <add>, %23, %cst_11 [1] : vector<8x32xf32> to vector<8xf32>
    %25 = vector.shape_cast %24 : vector<8xf32> to vector<8x1xf32>
    %cst_12 = arith.constant 3.200000e+01 : f32
    %26 = vector.broadcast %cst_12 : f32 to vector<8x1xf32>
    %27 = arith.divf %25, %26 : vector<8x1xf32>
    %cst_13 = arith.constant 9.99999974E-6 : f32
    %28 = vector.broadcast %cst_13 : f32 to vector<8x1xf32>
    %29 = arith.addf %27, %28 : vector<8x1xf32>
    %30 = math.rsqrt %29 : vector<8x1xf32>
    %31 = vector.broadcast %30 : vector<8x1xf32> to vector<8x32xf32>
    %32 = arith.mulf %22, %31 : vector<8x32xf32>
    %33 = vector.broadcast %14 : vector<1x32xf32> to vector<8x32xf32>
    %34 = arith.mulf %32, %33 : vector<8x32xf32>
    %35 = vector.broadcast %16 : vector<1x32xf32> to vector<8x32xf32>
    %36 = arith.addf %34, %35 : vector<8x32xf32>
    %37 = arith.truncf %36 : vector<8x32xf32> to vector<8x32xbf16>
    %c0_14 = arith.constant 0 : index
    %c0_15 = arith.constant 0 : index
    %c0_16 = arith.constant 0 : index
    %38 = vector.load %arg6[%c0_14, %c0_15, %c0_16] : memref<1x32x96xbf16, #tpu.memory_space<vmem>>, vector<1x32x96xbf16>
    %39 = vector.shape_cast %38 : vector<1x32x96xbf16> to vector<32x96xbf16>
    %cst_17 = arith.constant dense<0.000000e+00> : vector<8x96xf32>
    %40 = tpu.matmul %37, %39, %cst_17 {dimension_numbers = #tpu.dot_dimension_numbers<[1], [0], [0], [1], [0, 0, 1, 1], [], []>} : vector<8x32xbf16>, vector<32x96xbf16>, vector<8x96xf32> -> vector<8x96xf32>
    %c0_18 = arith.constant 0 : index
    %c0_19 = arith.constant 0 : index
    %c0_20 = arith.constant 0 : index
    %41 = vector.load %arg7[%c0_18, %c0_19, %c0_20] : memref<1x1x96xf32, #tpu.memory_space<vmem>>, vector<1x1x96xf32>
    %42 = vector.shape_cast %41 : vector<1x1x96xf32> to vector<1x96xf32>
    %43 = vector.broadcast %42 : vector<1x96xf32> to vector<8x96xf32>
    %44 = arith.addf %40, %43 : vector<8x96xf32>
    %45 = vector.extract_strided_slice %44 {offsets = [0, 0], sizes = [8, 32], strides = [1, 1]} : vector<8x96xf32> to vector<8x32xf32>
    %46 = vector.shape_cast %45 : vector<8x32xf32> to vector<8x2x16xf32>
    %47 = tpu.transpose %46, [1, 0, 2] : vector<8x2x16xf32> -> vector<2x8x16xf32>
    %48 = arith.truncf %47 : vector<2x8x16xf32> to vector<2x8x16xbf16>
    %49 = vector.extract_strided_slice %44 {offsets = [0, 32], sizes = [8, 32], strides = [1, 1]} : vector<8x96xf32> to vector<8x32xf32>
    %50 = vector.shape_cast %49 : vector<8x32xf32> to vector<8x2x16xf32>
    %51 = tpu.transpose %50, [1, 0, 2] : vector<8x2x16xf32> -> vector<2x8x16xf32>
    %52 = arith.truncf %51 : vector<2x8x16xf32> to vector<2x8x16xbf16>
    %53 = vector.extract_strided_slice %44 {offsets = [0, 64], sizes = [8, 32], strides = [1, 1]} : vector<8x96xf32> to vector<8x32xf32>
    %54 = vector.shape_cast %53 : vector<8x32xf32> to vector<8x2x16xf32>
    %55 = tpu.transpose %54, [1, 0, 2] : vector<8x2x16xf32> -> vector<2x8x16xf32>
    %56 = arith.truncf %55 : vector<2x8x16xf32> to vector<2x8x16xbf16>
    "tpu.trace_start"() <{level = 10 : i32, message = "hqd,hkd->hqk"}> : () -> ()
    %cst_21 = arith.constant dense<0.000000e+00> : vector<2x8x8xf32>
    %57 = tpu.matmul %48, %52, %cst_21 {dimension_numbers = #tpu.dot_dimension_numbers<[2], [2], [1], [1], [0, 0, 0, 1, 1, 1], [0], [0]>} : vector<2x8x16xbf16>, vector<2x8x16xbf16>, vector<2x8x8xf32> -> vector<2x8x8xf32>
    "tpu.trace_stop"() : () -> ()
    %cst_22 = arith.constant 2.500000e-01 : f32
    %58 = vector.broadcast %cst_22 : f32 to vector<2x8x8xf32>
    %59 = arith.mulf %57, %58 : vector<2x8x8xf32>
    %60 = vector.shape_cast %12 : vector<8x8xi1> to vector<1x8x8xi1>
    %cst_23 = arith.constant -1.000000e+04 : f32
    %61 = vector.shape_cast %60 : vector<1x8x8xi1> to vector<1x8x8xi1>
    %62 = vector.broadcast %61 : vector<1x8x8xi1> to vector<2x8x8xi1>
    %63 = vector.broadcast %cst_23 : f32 to vector<2x8x8xf32>
    %64 = arith.select %62, %59, %63 : vector<2x8x8xi1>, vector<2x8x8xf32>
    %cst_24 = arith.constant dense<0xFF800000> : vector<2x8xf32>
    %65 = vector.multi_reduction <maximumf>, %64, %cst_24 [2] : vector<2x8x8xf32> to vector<2x8xf32>
    %66 = vector.shape_cast %65 : vector<2x8xf32> to vector<2x8x1xf32>
    %67 = vector.broadcast %66 : vector<2x8x1xf32> to vector<2x8x8xf32>
    %68 = arith.subf %64, %67 : vector<2x8x8xf32>
    %69 = math.exp %68 : vector<2x8x8xf32>
    %cst_25 = arith.constant dense<0.000000e+00> : vector<2x8xf32>
    %70 = vector.multi_reduction <add>, %69, %cst_25 [2] : vector<2x8x8xf32> to vector<2x8xf32>
    %71 = vector.shape_cast %70 : vector<2x8xf32> to vector<2x8x1xf32>
    %72 = tpu.reciprocal %71 {approx = true} : vector<2x8x1xf32> -> vector<2x8x1xf32>
    %73 = vector.broadcast %72 : vector<2x8x1xf32> to vector<2x8x8xf32>
    %74 = arith.mulf %69, %73 : vector<2x8x8xf32>
    %75 = arith.truncf %74 : vector<2x8x8xf32> to vector<2x8x8xbf16>
    "tpu.trace_start"() <{level = 10 : i32, message = "hqk,hkd->hqd"}> : () -> ()
    %cst_26 = arith.constant dense<0.000000e+00> : vector<2x8x16xf32>
    %76 = tpu.matmul %75, %56, %cst_26 {dimension_numbers = #tpu.dot_dimension_numbers<[2], [1], [1], [2], [0, 0, 0, 1, 1, 2], [0], [0]>} : vector<2x8x8xbf16>, vector<2x8x16xbf16>, vector<2x8x16xf32> -> vector<2x8x16xf32>
    "tpu.trace_stop"() : () -> ()
    %77 = tpu.transpose %76, [1, 0, 2] : vector<2x8x16xf32> -> vector<8x2x16xf32>
    %78 = vector.shape_cast %77 : vector<8x2x16xf32> to vector<8x32xf32>
    %79 = arith.truncf %78 : vector<8x32xf32> to vector<8x32xbf16>
    %c0_27 = arith.constant 0 : index
    %c0_28 = arith.constant 0 : index
    %c0_29 = arith.constant 0 : index
    %80 = vector.load %arg8[%c0_27, %c0_28, %c0_29] : memref<1x32x32xbf16, #tpu.memory_space<vmem>>, vector<1x32x32xbf16>
    %81 = vector.shape_cast %80 : vector<1x32x32xbf16> to vector<32x32xbf16>
    %cst_30 = arith.constant dense<0.000000e+00> : vector<8x32xf32>
    %82 = tpu.matmul %79, %81, %cst_30 {dimension_numbers = #tpu.dot_dimension_numbers<[1], [0], [0], [1], [0, 0, 1, 1], [], []>} : vector<8x32xbf16>, vector<32x32xbf16>, vector<8x32xf32> -> vector<8x32xf32>
    %c0_31 = arith.constant 0 : index
    %c0_32 = arith.constant 0 : index
    %c0_33 = arith.constant 0 : index
    %83 = vector.load %arg9[%c0_31, %c0_32, %c0_33] : memref<1x1x32xf32, #tpu.memory_space<vmem>>, vector<1x1x32xf32>
    %84 = vector.shape_cast %83 : vector<1x1x32xf32> to vector<1x32xf32>
    %85 = vector.broadcast %84 : vector<1x32xf32> to vector<8x32xf32>
    %86 = arith.addf %82, %85 : vector<8x32xf32>
    %87 = arith.addf %5, %86 : vector<8x32xf32>
    %c0_34 = arith.constant 0 : index
    %c0_35 = arith.constant 0 : index
    %c0_36 = arith.constant 0 : index
    %88 = vector.load %arg10[%c0_34, %c0_35, %c0_36] : memref<1x1x32xf32, #tpu.memory_space<vmem>>, vector<1x1x32xf32>
    %89 = vector.shape_cast %88 : vector<1x1x32xf32> to vector<1x32xf32>
    %c0_37 = arith.constant 0 : index
    %c0_38 = arith.constant 0 : index
    %c0_39 = arith.constant 0 : index
    %90 = vector.load %arg11[%c0_37, %c0_38, %c0_39] : memref<1x1x32xf32, #tpu.memory_space<vmem>>, vector<1x1x32xf32>
    %91 = vector.shape_cast %90 : vector<1x1x32xf32> to vector<1x32xf32>
    %cst_40 = arith.constant dense<0.000000e+00> : vector<8xf32>
    %92 = vector.multi_reduction <add>, %87, %cst_40 [1] : vector<8x32xf32> to vector<8xf32>
    %93 = vector.shape_cast %92 : vector<8xf32> to vector<8x1xf32>
    %cst_41 = arith.constant 3.200000e+01 : f32
    %94 = vector.broadcast %cst_41 : f32 to vector<8x1xf32>
    %95 = arith.divf %93, %94 : vector<8x1xf32>
    %96 = vector.broadcast %95 : vector<8x1xf32> to vector<8x32xf32>
    %97 = arith.subf %87, %96 : vector<8x32xf32>
    %98 = arith.mulf %97, %97 : vector<8x32xf32>
    %cst_42 = arith.constant dense<0.000000e+00> : vector<8xf32>
    %99 = vector.multi_reduction <add>, %98, %cst_42 [1] : vector<8x32xf32> to vector<8xf32>
    %100 = vector.shape_cast %99 : vector<8xf32> to vector<8x1xf32>
    %cst_43 = arith.constant 3.200000e+01 : f32
    %101 = vector.broadcast %cst_43 : f32 to vector<8x1xf32>
    %102 = arith.divf %100, %101 : vector<8x1xf32>
    %cst_44 = arith.constant 9.99999974E-6 : f32
    %103 = vector.broadcast %cst_44 : f32 to vector<8x1xf32>
    %104 = arith.addf %102, %103 : vector<8x1xf32>
    %105 = math.rsqrt %104 : vector<8x1xf32>
    %106 = vector.broadcast %105 : vector<8x1xf32> to vector<8x32xf32>
    %107 = arith.mulf %97, %106 : vector<8x32xf32>
    %108 = vector.broadcast %89 : vector<1x32xf32> to vector<8x32xf32>
    %109 = arith.mulf %107, %108 : vector<8x32xf32>
    %110 = vector.broadcast %91 : vector<1x32xf32> to vector<8x32xf32>
    %111 = arith.addf %109, %110 : vector<8x32xf32>
    %112 = arith.truncf %111 : vector<8x32xf32> to vector<8x32xbf16>
    %c0_45 = arith.constant 0 : index
    %c0_46 = arith.constant 0 : index
    %c0_47 = arith.constant 0 : index
    %113 = vector.load %arg12[%c0_45, %c0_46, %c0_47] : memref<1x32x128xbf16, #tpu.memory_space<vmem>>, vector<1x32x128xbf16>
    %114 = vector.shape_cast %113 : vector<1x32x128xbf16> to vector<32x128xbf16>
    %cst_48 = arith.constant dense<0.000000e+00> : vector<8x128xf32>
    %115 = tpu.matmul %112, %114, %cst_48 {dimension_numbers = #tpu.dot_dimension_numbers<[1], [0], [0], [1], [0, 0, 1, 1], [], []>} : vector<8x32xbf16>, vector<32x128xbf16>, vector<8x128xf32> -> vector<8x128xf32>
    %c0_49 = arith.constant 0 : index
    %c0_50 = arith.constant 0 : index
    %c0_51 = arith.constant 0 : index
    %116 = vector.load %arg13[%c0_49, %c0_50, %c0_51] : memref<1x1x128xf32, #tpu.memory_space<vmem>>, vector<1x1x128xf32>
    %117 = vector.shape_cast %116 : vector<1x1x128xf32> to vector<1x128xf32>
    %118 = vector.broadcast %117 : vector<1x128xf32> to vector<8x128xf32>
    %119 = arith.addf %115, %118 : vector<8x128xf32>
    %cst_52 = arith.constant 5.000000e-01 : f32
    %120 = vector.broadcast %cst_52 : f32 to vector<8x128xf32>
    %121 = arith.mulf %119, %120 : vector<8x128xf32>
    %cst_53 = arith.constant 0.797884583 : f32
    %122 = vector.broadcast %cst_53 : f32 to vector<8x128xf32>
    %123 = arith.mulf %122, %119 : vector<8x128xf32>
    %cst_54 = arith.constant 4.471500e-02 : f32
    %124 = vector.broadcast %cst_54 : f32 to vector<8x128xf32>
    %125 = arith.mulf %124, %119 : vector<8x128xf32>
    %126 = arith.mulf %125, %119 : vector<8x128xf32>
    %cst_55 = arith.constant 1.000000e+00 : f32
    %127 = vector.broadcast %cst_55 : f32 to vector<8x128xf32>
    %128 = arith.addf %127, %126 : vector<8x128xf32>
    %129 = arith.mulf %123, %128 : vector<8x128xf32>
    %130 = math.tanh %129 : vector<8x128xf32>
    %cst_56 = arith.constant 1.000000e+00 : f32
    %131 = vector.broadcast %cst_56 : f32 to vector<8x128xf32>
    %132 = arith.addf %131, %130 : vector<8x128xf32>
    %133 = arith.mulf %121, %132 : vector<8x128xf32>
    %134 = arith.truncf %133 : vector<8x128xf32> to vector<8x128xbf16>
    %c0_57 = arith.constant 0 : index
    %c0_58 = arith.constant 0 : index
    %c0_59 = arith.constant 0 : index
    %135 = vector.load %arg14[%c0_57, %c0_58, %c0_59] : memref<1x128x32xbf16, #tpu.memory_space<vmem>>, vector<1x128x32xbf16>
    %136 = vector.shape_cast %135 : vector<1x128x32xbf16> to vector<128x32xbf16>
    %cst_60 = arith.constant dense<0.000000e+00> : vector<8x32xf32>
    %137 = tpu.matmul %134, %136, %cst_60 {dimension_numbers = #tpu.dot_dimension_numbers<[1], [0], [0], [1], [0, 0, 1, 1], [], []>} : vector<8x128xbf16>, vector<128x32xbf16>, vector<8x32xf32> -> vector<8x32xf32>
    %c0_61 = arith.constant 0 : index
    %c0_62 = arith.constant 0 : index
    %c0_63 = arith.constant 0 : index
    %138 = vector.load %arg15[%c0_61, %c0_62, %c0_63] : memref<1x1x32xf32, #tpu.memory_space<vmem>>, vector<1x1x32xf32>
    %139 = vector.shape_cast %138 : vector<1x1x32xf32> to vector<1x32xf32>
    %140 = vector.broadcast %139 : vector<1x32xf32> to vector<8x32xf32>
    %141 = arith.addf %137, %140 : vector<8x32xf32>
    %142 = arith.addf %87, %141 : vector<8x32xf32>
    %143 = arith.truncf %142 : vector<8x32xf32> to vector<8x32xbf16>
    %c0_64 = arith.constant 0 : index
    %c0_65 = arith.constant 0 : index
    %c0_66 = arith.constant 0 : index
    %144 = vector.load %arg16[%c0_64, %c0_65, %c0_66] : memref<1x8x32xbf16, #tpu.memory_space<vmem>>, vector<1x8x32xbf16>
    %145 = vector.shape_cast %144 : vector<1x8x32xbf16> to vector<8x32xbf16>
    %146 = vector.shape_cast %143 : vector<8x32xbf16> to vector<1x8x32xbf16>
    tpu.vector_store %arg16[%c0_64, %c0_65, %c0_66], %146 {strides = array<i32>} : memref<1x8x32xbf16, #tpu.memory_space<vmem>>, vector<1x8x32xbf16>,
    return
  }
  func.func @transform_0(%arg0: i32, %arg1: i32, %arg2: memref<1xi32, #tpu.memory_space<smem>>) -> (i32, i32, i32) {
    %c0_i32 = arith.constant 0 : i32
    %c0_i32_0 = arith.constant 0 : i32
    %c0_i32_1 = arith.constant 0 : i32
    return %arg0, %c0_i32, %c0_i32_0 : i32, i32, i32
  }
  func.func @transform_1(%arg0: i32, %arg1: i32, %arg2: memref<1xi32, #tpu.memory_space<smem>>) -> (i32, i32, i32) {
    %c0_i32 = arith.constant 0 : i32
    %c0_i32_0 = arith.constant 0 : i32
    %c0_i32_1 = arith.constant 0 : i32
    return %arg1, %c0_i32, %c0_i32_0 : i32, i32, i32
  }
  func.func @transform_2(%arg0: i32, %arg1: i32, %arg2: memref<1xi32, #tpu.memory_space<smem>>) -> (i32, i32, i32) {
    %c0_i32 = arith.constant 0 : i32
    %c0_i32_0 = arith.constant 0 : i32
    %c0_i32_1 = arith.constant 0 : i32
    return %arg1, %c0_i32, %c0_i32_0 : i32, i32, i32
  }
  func.func @transform_3(%arg0: i32, %arg1: i32, %arg2: memref<1xi32, #tpu.memory_space<smem>>) -> (i32, i32, i32) {
    %c0_i32 = arith.constant 0 : i32
    %c0_i32_0 = arith.constant 0 : i32
    %c0_i32_1 = arith.constant 0 : i32
    return %arg1, %c0_i32, %c0_i32_0 : i32, i32, i32
  }
  func.func @transform_4(%arg0: i32, %arg1: i32, %arg2: memref<1xi32, #tpu.memory_space<smem>>) -> (i32, i32, i32) {
    %c0_i32 = arith.constant 0 : i32
    %c0_i32_0 = arith.constant 0 : i32
    %c0_i32_1 = arith.constant 0 : i32
    return %arg1, %c0_i32, %c0_i32_0 : i32, i32, i32
  }
  func.func @transform_5(%arg0: i32, %arg1: i32, %arg2: memref<1xi32, #tpu.memory_space<smem>>) -> (i32, i32, i32) {
    %c0_i32 = arith.constant 0 : i32
    %c0_i32_0 = arith.constant 0 : i32
    %c0_i32_1 = arith.constant 0 : i32
    return %arg1, %c0_i32, %c0_i32_0 : i32, i32, i32
  }
  func.func @transform_6(%arg0: i32, %arg1: i32, %arg2: memref<1xi32, #tpu.memory_space<smem>>) -> (i32, i32, i32) {
    %c0_i32 = arith.constant 0 : i32
    %c0_i32_0 = arith.constant 0 : i32
    %c0_i32_1 = arith.constant 0 : i32
    return %arg1, %c0_i32, %c0_i32_0 : i32, i32, i32
  }
  func.func @transform_7(%arg0: i32, %arg1: i32, %arg2: memref<1xi32, #tpu.memory_space<smem>>) -> (i32, i32, i32) {
    %c0_i32 = arith.constant 0 : i32
    %c0_i32_0 = arith.constant 0 : i32
    %c0_i32_1 = arith.constant 0 : i32
    return %arg1, %c0_i32, %c0_i32_0 : i32, i32, i32
  }
  func.func @transform_8(%arg0: i32, %arg1: i32, %arg2: memref<1xi32, #tpu.memory_space<smem>>) -> (i32, i32, i32) {
    %c0_i32 = arith.constant 0 : i32
    %c0_i32_0 = arith.constant 0 : i32
    %c0_i32_1 = arith.constant 0 : i32
    return %arg1, %c0_i32, %c0_i32_0 : i32, i32, i32
  }
  func.func @transform_9(%arg0: i32, %arg1: i32, %arg2: memref<1xi32, #tpu.memory_space<smem>>) -> (i32, i32, i32) {
    %c0_i32 = arith.constant 0 : i32
    %c0_i32_0 = arith.constant 0 : i32
    %c0_i32_1 = arith.constant 0 : i32
    return %arg1, %c0_i32, %c0_i32_0 : i32, i32, i32
  }
  func.func @transform_10(%arg0: i32, %arg1: i32, %arg2: memref<1xi32, #tpu.memory_space<smem>>) -> (i32, i32, i32) {
    %c0_i32 = arith.constant 0 : i32
    %c0_i32_0 = arith.constant 0 : i32
    %c0_i32_1 = arith.constant 0 : i32
    return %arg1, %c0_i32, %c0_i32_0 : i32, i32, i32
  }
  func.func @transform_11(%arg0: i32, %arg1: i32, %arg2: memref<1xi32, #tpu.memory_space<smem>>) -> (i32, i32, i32) {
    %c0_i32 = arith.constant 0 : i32
    %c0_i32_0 = arith.constant 0 : i32
    %c0_i32_1 = arith.constant 0 : i32
    return %arg1, %c0_i32, %c0_i32_0 : i32, i32, i32
  }
  func.func @transform_12(%arg0: i32, %arg1: i32, %arg2: memref<1xi32, #tpu.memory_space<smem>>) -> (i32, i32, i32) {
    %c0_i32 = arith.constant 0 : i32
    %c0_i32_0 = arith.constant 0 : i32
    %c0_i32_1 = arith.constant 0 : i32
    return %arg1, %c0_i32, %c0_i32_0 : i32, i32, i32
  }
  func.func @transform_13(%arg0: i32, %arg1: i32, %arg2: memref<1xi32, #tpu.memory_space<smem>>) -> (i32, i32, i32) {
    %c0_i32 = arith.constant 0 : i32
    %c0_i32_0 = arith.constant 0 : i32
    %c0_i32_1 = arith.constant 0 : i32
    return %arg0, %c0_i32, %c0_i32_0 : i32, i32, i32
  }
}

</mosaic_0001>

<bundles_post_ra>
// kernel: tpu_custom_call.1
= control target key start
LH: loop header
LB: loop body
LE: loop exit
PB: predicated region body
PF: predicated region fallthrough
CT: control target
= control target key end

     0   :  { %s4244_s0 = inlined_call_operand.<no memory space> [shape: s32[1], index: 0, kind: input, shape index: {}]   ;;  %s4245_s1 = inlined_call_operand.hbm [shape: bf16[2,8,32], index: 1, kind: input, shape index: {}]   ;;  %s4246_s2 = inlined_call_operand.hbm [shape: f32[2,1,32], index: 2, kind: input, shape index: {}]   ;;  %s4247_s3 = inlined_call_operand.hbm [shape: f32[2,1,32], index: 3, kind: input, shape index: {}]   ;;  %s4248_s4 = inlined_call_operand.hbm [shape: bf16[2,32,96], index: 4, kind: input, shape index: {}]   ;;  %s4249_s5 = inlined_call_operand.hbm [shape: f32[2,1,96], index: 5, kind: input, shape index: {}]   ;;  %s4250_s6 = inlined_call_operand.hbm [shape: bf16[2,32,32], index: 6, kind: input, shape index: {}]   ;;  %s4251_s7 = inlined_call_operand.hbm [shape: f32[2,1,32], index: 7, kind: input, shape index: {}]   ;;  %s4252_s8 = inlined_call_operand.hbm [shape: f32[2,1,32], index: 8, kind: input, shape index: {}]   ;;  %s4253_s9 = inlined_call_operand.hbm [shape: f32[2,1,32], index: 9, kind: input, shape index: {}]   ;;  %s4254_s10 = inlined_call_operand.hbm [shape: bf16[2,32,128], index: 10, kind: input, shape index: {}]   ;;  %s4255_s11 = inlined_call_operand.hbm [shape: f32[2,1,128], index: 11, kind: input, shape index: {}]   ;;  %s4256_s12 = inlined_call_operand.hbm [shape: bf16[2,128,32], index: 12, kind: input, shape index: {}]   ;;  %s4257_s13 = inlined_call_operand.hbm [shape: f32[2,1,32], index: 13, kind: input, shape index: {}]   ;;  %s4258_s14 = inlined_call_operand.hbm [shape: bf16[2,8,32], index: 14, kind: output, shape index: {}]  }
   0x1   :  { %4295 = sst [smem:[#allocation46_spill]] %s4245_s1 }
   0x2   :  { %4296 = sst [smem:[#allocation47_spill]] %s4246_s2 }
   0x3   :  { %4297 = sst [smem:[#allocation48_spill]] %s4247_s3 }
   0x4   :  { %4298 = sst [smem:[#allocation49_spill]] %s4248_s4 }
   0x5   :  { %4299 = sst [smem:[#allocation50_spill]] %s4249_s5 }
   0x6   :  { %4300 = sst [smem:[#allocation51_spill]] %s4250_s6 }
   0x7   :  { %4301 = sst [smem:[#allocation52_spill]] %s4251_s7 }
   0x8   :  { %4302 = sst [smem:[#allocation53_spill]] %s4252_s8 }
   0x9   :  { %4303 = sst [smem:[#allocation54_spill]] %s4253_s9 }
   0xa   :  { %4304 = sst [smem:[#allocation55_spill]] %s4254_s10 }
   0xb   :  { %4305 = sst [smem:[#allocation56_spill]] %s4255_s11 }
   0xc   :  { %4306 = sst [smem:[#allocation57_spill]] %s4256_s12 }
   0xd   :  { %4307 = sst [smem:[#allocation58_spill]] %s4257_s13 }
   0xe   :  { %4308 = sst [smem:[#allocation59_spill]] %s4258_s14 }
   0xf   :  { %19 = sst [smem:[#allocation3]] %s4244_s0 }
  0x10   :  { %20 = vsyncpa [#allocation5], 0 }
  0x11   :  { %22 = vsyncpa [#allocation5 + $0x1], 0 }
  0x12   :  { %23 = vsyncpa [#allocation8], 0 }
  0x13   :  { %25 = vsyncpa [#allocation8 + $0x1], 0 }
  0x14   :  { %26 = vsyncpa [#allocation11], 0 }
  0x15   :  { %28 = vsyncpa [#allocation11 + $0x1], 0 }
  0x16   :  { %29 = vsyncpa [#allocation14], 0 }
  0x17   :  { %31 = vsyncpa [#allocation14 + $0x1], 0 }
  0x18   :  { %32 = vsyncpa [#allocation17], 0 }
  0x19   :  { %34 = vsyncpa [#allocation17 + $0x1], 0 }
  0x1a   :  { %35 = vsyncpa [#allocation20], 0 }
  0x1b   :  { %37 = vsyncpa [#allocation20 + $0x1], 0 }
  0x1c   :  { %38 = vsyncpa [#allocation23], 0 }
  0x1d   :  { %40 = vsyncpa [#allocation23 + $0x1], 0 }
  0x1e   :  { %41 = vsyncpa [#allocation6], 0 }
  0x1f   :  { %43 = vsyncpa [#allocation6 + $0x1], 0  ;;  %s3340_s15 = smov 0   ;;  %s3342_s16 = smov 0  }
  0x20   :  { %s3344_s0 = smov 0   ;;  %s3346_s17 = smov 0  }
  0x21   :  { %s3348_s18 = smov 0   ;;  %s3350_s19 = smov 0  }
  0x22   :  { %s3352_s20 = smov 0   ;;  %s3354_s21 = smov 0  }
  0x23   :  { %s3356_s22 = smov 0   ;;  %s3358_s23 = smov 0  }
  0x24   :  { %s3360_s24 = smov 0  }
  0x25 LB: > { %4309 = sst [smem:[#allocation34_spill]] %s3200_s16  ;;  %p4266_p0 = scmp.eq.s32.totalorder %s3236_s24, 0  ;;  %s3236_s24 = sphi %s3360_s24, %s49_s24   ;;  %s3232_s23 = sphi %s3358_s23, %s4386_s23   ;;  %s3228_s22 = sphi %s3356_s22, %s4385_s22   ;;  %s3224_s21 = sphi %s3354_s21, %s4384_s21   ;;  %s3220_s20 = sphi %s3352_s20, %s4383_s20   ;;  %s3216_s19 = sphi %s3350_s19, %s4382_s19   ;;  %s3212_s18 = sphi %s3348_s18, %s4388_s18   ;;  %s3208_s17 = sphi %s3346_s17, %s4387_s17   ;;  %s3204_s0 = sphi %s3344_s0, %s4380_s0   ;;  %s3200_s16 = sphi %s3342_s16, %s4379_s16   ;;  %s3196_s15 = sphi %s3340_s15, %s4378_s15  }
  0x26   : > { %4310 = sst [smem:[#allocation35_spill]] %s3204_s0  ;;  %p101_p1 = scmp.ne.s32.totalorder %s3204_s0, %s3200_s16 }
  0x27   : > { %4311 = sst [smem:[#allocation36_spill]] %s3216_s19  ;;  %p4265_p2 = scmp.lt.s32.totalorder %s3236_s24, 4 }
  0x28   : > { %4312 = sst [smem:[#allocation37_spill]] %s3220_s20  ;;  %p103_p3 = por %p101_p1, %p4266_p0 }
  0x29   : > { %4313 = sst [smem:[#allocation38_spill]] %s3224_s21  ;;  %s3402_s25 = sand.u32 1, %s3236_s24  }
  0x2a   : > { %4314 = sst [smem:[#allocation39_spill]] %s3228_s22  ;;  %s3405_s26 = sand.u32 1, %s3204_s0  }
  0x2b   : > { %4315 = sst [smem:[#allocation40_spill]] %s3232_s23  ;;  %s3408_s27 = sshll.u32 %s3228_s22, 4 }
  0x2c   : > { %s4316_s2 = sld [smem:[#allocation47_spill]]  ;;  %s464_s14 = scalar_lea.vmem [#allocation7], %s3405_s26 }
  0x2d   : > { %s471_s21 = sshll.u32 %s464_s14, 4  ;;  %p3421_p4 = pnand %p4265_p2, %p103_p3  ;;  %s3417_s21 = int_to_ptr.vmem [resolvable:$true] %s471_s21 }
  0x2f   : > { %s4317_s20 = scalar_select %p3421_p4, 1, 0 }
  0x30   : > { %p3432_p8 = pneg %p3421_p4 }
  0x32   : > { %s3414_s30 = scalar_lea.hbm %s4316_s2, %s3408_s27  ;;  %s2705_s9 = scalar_lea.hbm %s4316_s2, 32 }
  0x33   : > { %s2700_s28 = scalar_lea.hbm %s3414_s30, 16  ;;  %p2706_p11 = scmp.lt.u32.totalorder %s3414_s30, %s4316_s2 }
  0x34   : > { %p2701_p7 = scmp.ne.s32.totalorder %s3414_s30, %s2700_s28  ;;  %p2707_p12 = scmp.lt.u32.totalorder %s2705_s9, %s2700_s28 }
  0x35   : > { %p2709_p1 = scmp.lt.u32.totalorder %s2700_s28, %s3414_s30 }
  0x36   : > { %p2703_p9 = pnand %p3432_p8, %p2701_p7  ;;  %p2708_p13 = por %p2707_p12, %p2706_p11 }
  0x38   : > { %p2704_p10 = pneg %p2703_p9  ;;  %p2710_p3 = por %p2709_p1, %p2708_p13 }
  0x3a   : > { %p2711_p2 = pnand %p2710_p3, %p2704_p10 }
  0x3c   : > { %2714 = shalt.err (!%p2711_p2)
}
  0x3d   : > { %s2715_s13 = scalar_lea.vmem %s3417_s21, 16  ;;  %s3238_s11 = smov [#allocation7]  }
  0x3e   : > { %p2716_p7 = scmp.ne.s32.totalorder %s3417_s21, %s2715_s13  ;;  %s2720_s14 = sshll.u32 %s3238_s11, 4  ;;  %s2721_s14 = int_to_ptr.vmem [resolvable:$false] %s2720_s14 }
  0x3f   : > { %s2722_s5 = scalar_lea.vmem %s2721_s14, 32  ;;  %p2723_p5 = scmp.lt.s32.totalorder %s3417_s21, %s2721_s14 }
  0x40   : > { %p2718_p9 = pnand %p2716_p7, %p3432_p8  ;;  %p2724_p6 = scmp.lt.s32.totalorder %s2722_s5, %s2715_s13 }
  0x42   : > { %p2719_p0 = pneg %p2718_p9  ;;  %p2725_p11 = por %p2724_p6, %p2723_p5 }
  0x44   : > { %p2726_p12 = pnand %p2725_p11, %p2719_p0 }
  0x46   : > { %2729 = shalt.err (!%p2726_p12)
}
  0x47   : > { %s4319_s7 = scalar_lea.sflag [#allocation8], %s3402_s25  ;;  %p4320_p2 = scmp.lt.s32.totalorder %s3236_s24, 5 }
  0x48   : > { %2534 = dma.hbm_to_vmem [thread:$0]  (!%p3421_p4), %s3414_s30, 16, %s3417_s21, %s4319_s7  }
  0x49   : > { %p4321_p10 = scmp.ge.s32.totalorder %s3236_s24, 1  ;;  %s3466_s13 = sshll.u32 %s3405_s26, 4 }
  0x4a   : > { %s3469_s28 = sshll.u32 %s3228_s22, 8  ;;  %s4324_s4 = sld [smem:[#allocation49_spill]] }
  0x4b   : > { %p3461_p13 = pnand %p4321_p10, %p4320_p2  ;;  %s499_s21 = scalar_lea.vmem [#allocation10], %s3466_s13 }
  0x4c   : > { %s506_s30 = sshll.u32 %s499_s21, 4  ;;  %s4271_s7 = scalar_lea.sflag [#allocation11], %s3402_s25  ;;  %s3478_s30 = int_to_ptr.vmem [resolvable:$true] %s506_s30 }
  0x4d   : > { %s4322_s9 = scalar_select %p3461_p13, 1, 0 }
  0x4f   : > { %4323 = sst [smem:[#allocation41_spill]] %s4322_s9 }
  0x50   : > { %s3475_s5 = scalar_lea.hbm %s4324_s4, %s3469_s28  ;;  %s2735_s11 = scalar_lea.hbm %s4324_s4, 512 }
  0x51   : > { %s2730_s2 = scalar_lea.hbm %s3475_s5, 256  ;;  %p2736_p1 = scmp.lt.u32.totalorder %s3475_s5, %s4324_s4 }
  0x52   : > { %p2731_p0 = scmp.ne.s32.totalorder %s3475_s5, %s2730_s2  ;;  %p2737_p3 = scmp.lt.u32.totalorder %s2735_s11, %s2730_s2 }
  0x53   : > { %p2739_p9 = scmp.lt.u32.totalorder %s2730_s2, %s3475_s5 }
  0x54   : > { %p2733_p5 = pnand %p2731_p0, %p3432_p8  ;;  %p2738_p7 = por %p2737_p3, %p2736_p1 }
  0x56   : > { %p2734_p6 = pneg %p2733_p5  ;;  %p2740_p11 = por %p2739_p9, %p2738_p7 }
  0x58   : > { %p2741_p12 = pnand %p2740_p11, %p2734_p6 }
  0x5a   : > { %2744 = shalt.err (!%p2741_p12)
}
  0x5b   : > { %s2745_s21 = scalar_lea.vmem %s3478_s30, 256  ;;  %s3239_s3 = smov [#allocation10]  }
  0x5c   : > { %p2746_p2 = scmp.ne.s32.totalorder %s3478_s30, %s2745_s21  ;;  %s2750_s9 = sshll.u32 %s3239_s3, 4  ;;  %s2751_s9 = int_to_ptr.vmem [resolvable:$false] %s2750_s9 }
  0x5d   : > { %s2752_s1 = scalar_lea.vmem %s2751_s9, 512  ;;  %p2753_p5 = scmp.lt.s32.totalorder %s3478_s30, %s2751_s9 }
  0x5e   : > { %p2748_p10 = pnand %p2746_p2, %p3432_p8  ;;  %p2754_p13 = scmp.lt.s32.totalorder %s2752_s1, %s2745_s21 }
  0x60   : > { %p2749_p0 = pneg %p2748_p10  ;;  %p2755_p1 = por %p2754_p13, %p2753_p5 }
  0x62   : > { %p2756_p3 = pnand %p2755_p1, %p2749_p0 }
  0x64   : > { %2759 = shalt.err (!%p2756_p3)
}
  0x65   : > { %s4273_s2 = smov 64   ;;  %s3241_s11 = smov 4  }
  0x66   : > { %2540 = dma.hbm_to_vmem [thread:$0]  (!%p3421_p4), %s3475_s5, 256, %s3478_s30, %s4271_s7, %s4273_s2, %s4273_s2, %s3241_s11  }
  0x67   : > { %s4325_s6 = sld [smem:[#allocation51_spill]]  ;;  %s537_s9 = scalar_lea.vmem [#allocation13], %s3466_s13 }
  0x68   : > { %s544_s1 = sshll.u32 %s537_s9, 4  ;;  %s4272_s4 = scalar_lea.sflag [#allocation14], %s3402_s25  ;;  %s3514_s1 = int_to_ptr.vmem [resolvable:$true] %s544_s1 }
  0x6d   : > { %s3511_s3 = scalar_lea.hbm %s4325_s6, %s3469_s28  ;;  %s2765_s14 = scalar_lea.hbm %s4325_s6, 512 }
  0x6e   : > { %s2760_s16 = scalar_lea.hbm %s3511_s3, 256  ;;  %p2766_p9 = scmp.lt.u32.totalorder %s3511_s3, %s4325_s6 }
  0x6f   : > { %p2761_p13 = scmp.ne.s32.totalorder %s3511_s3, %s2760_s16  ;;  %p2767_p11 = scmp.lt.u32.totalorder %s2765_s14, %s2760_s16 }
  0x70   : > { %p2769_p2 = scmp.lt.u32.totalorder %s2760_s16, %s3511_s3 }
  0x71   : > { %p2763_p6 = pnand %p2761_p13, %p3432_p8  ;;  %p2768_p12 = por %p2767_p11, %p2766_p9 }
  0x73   : > { %p2764_p7 = pneg %p2763_p6  ;;  %p2770_p10 = por %p2769_p2, %p2768_p12 }
  0x75   : > { %p2771_p0 = pnand %p2770_p10, %p2764_p7 }
  0x77   : > { %2774 = shalt.err (!%p2771_p0)
}
  0x78   : > { %s2775_s9 = scalar_lea.vmem %s3514_s1, 256  ;;  %s3242_s5 = smov [#allocation13]  }
  0x79   : > { %p2776_p5 = scmp.ne.s32.totalorder %s3514_s1, %s2775_s9  ;;  %s2780_s30 = sshll.u32 %s3242_s5, 4  ;;  %s2781_s30 = int_to_ptr.vmem [resolvable:$false] %s2780_s30 }
  0x7a   : > { %s2782_s7 = scalar_lea.vmem %s2781_s30, 512  ;;  %p2783_p13 = scmp.lt.s32.totalorder %s3514_s1, %s2781_s30 }
  0x7b   : > { %p2778_p1 = pnand %p2776_p5, %p3432_p8  ;;  %p2784_p6 = scmp.lt.s32.totalorder %s2782_s7, %s2775_s9 }
  0x7d   : > { %p2779_p3 = pneg %p2778_p1  ;;  %p2785_p9 = por %p2784_p6, %p2783_p13 }
  0x7f   : > { %p2786_p11 = pnand %p2785_p9, %p2779_p3 }
  0x81   : > { %2789 = shalt.err (!%p2786_p11)
}
  0x82   : > { %2546 = dma.hbm_to_vmem [thread:$0]  (!%p3421_p4), %s3511_s3, 256, %s3514_s1, %s4272_s4, %s4273_s2, %s4273_s2, %s3241_s11  }
  0x83   : > { %s4326_s8 = sld [smem:[#allocation53_spill]]  ;;  %s574_s9 = scalar_lea.vmem [#allocation16], %s3405_s26 }
  0x84   : > { %s581_s5 = sshll.u32 %s574_s9, 4  ;;  %s4279_s30 = scalar_lea.sflag [#allocation17], %s3402_s25  ;;  %s582_s5 = int_to_ptr.vmem [resolvable:$true] %s581_s5 }
  0x89   : > { %s3547_s21 = scalar_lea.hbm %s4326_s8, %s3408_s27  ;;  %s2795_s1 = scalar_lea.hbm %s4326_s8, 32 }
  0x8a   : > { %s2790_s7 = scalar_lea.hbm %s3547_s21, 16  ;;  %p2796_p10 = scmp.lt.u32.totalorder %s3547_s21, %s4326_s8 }
  0x8b   : > { %p2791_p7 = scmp.ne.s32.totalorder %s3547_s21, %s2790_s7  ;;  %p2797_p0 = scmp.lt.u32.totalorder %s2795_s1, %s2790_s7 }
  0x8c   : > { %p2799_p1 = scmp.lt.u32.totalorder %s2790_s7, %s3547_s21 }
  0x8d   : > { %p2793_p12 = pnand %p2791_p7, %p3432_p8  ;;  %p2798_p5 = por %p2797_p0, %p2796_p10 }
  0x8f   : > { %p2794_p2 = pneg %p2793_p12  ;;  %p2800_p3 = por %p2799_p1, %p2798_p5 }
  0x91   : > { %p2801_p13 = pnand %p2800_p3, %p2794_p2 }
  0x93   : > { %2804 = shalt.err (!%p2801_p13)
}
  0x94   : > { %s2805_s9 = scalar_lea.vmem %s582_s5, 16  ;;  %s3243_s4 = smov [#allocation16]  }
  0x95   : > { %p2806_p6 = scmp.ne.s32.totalorder %s582_s5, %s2805_s9  ;;  %s2810_s2 = sshll.u32 %s3243_s4, 4  ;;  %s2811_s2 = int_to_ptr.vmem [resolvable:$false] %s2810_s2 }
  0x96   : > { %s2812_s6 = scalar_lea.vmem %s2811_s2, 32  ;;  %p2813_p7 = scmp.lt.s32.totalorder %s582_s5, %s2811_s2 }
  0x97   : > { %p2808_p9 = pnand %p2806_p6, %p3432_p8  ;;  %p2814_p12 = scmp.lt.s32.totalorder %s2812_s6, %s2805_s9 }
  0x99   : > { %p2809_p11 = pneg %p2808_p9  ;;  %p2815_p4 = por %p2814_p12, %p2813_p7 }
  0x9b   : > { %p2816_p0 = pnand %p2815_p4, %p2809_p11 }
  0x9d   : > { %2819 = shalt.err (!%p2816_p0)
}
  0x9e   : > { %p4327_p10 = scmp.ne.s32.totalorder %s4317_s20, 0  ;;  %s4328_s10 = sld [smem:[#allocation55_spill]] }
  0x9f   : > { %s609_s2 = scalar_lea.vmem [#allocation19], %s3466_s13  ;;  %s2349_s16 = sshll.u32 %s3405_s26, 6 }
  0xa0   : > { %2552 = dma.hbm_to_vmem [thread:$0]  (!%p4327_p10), %s3547_s21, 16, %s582_s5, %s4279_s30  }
  0xa1   : > { %s616_s1 = sshll.u32 %s609_s2, 4  ;;  %s4278_s14 = scalar_lea.sflag [#allocation20], %s3402_s25  ;;  %s3577_s1 = int_to_ptr.vmem [resolvable:$true] %s616_s1 }
  0xa4   : > { %s3574_s3 = scalar_lea.hbm %s4328_s10, %s3469_s28  ;;  %s2825_s28 = scalar_lea.hbm %s4328_s10, 512 }
  0xa5   : > { %s2820_s9 = scalar_lea.hbm %s3574_s3, 256  ;;  %p2826_p1 = scmp.lt.u32.totalorder %s3574_s3, %s4328_s10 }
  0xa6   : > { %p2821_p4 = scmp.ne.s32.totalorder %s3574_s3, %s2820_s9  ;;  %p2827_p3 = scmp.lt.u32.totalorder %s2825_s28, %s2820_s9 }
  0xa7   : > { %p2829_p6 = scmp.lt.u32.totalorder %s2820_s9, %s3574_s3 }
  0xa8   : > { %p2823_p2 = pnand %p2821_p4, %p3432_p8  ;;  %p2828_p13 = por %p2827_p3, %p2826_p1 }
  0xaa   : > { %p2824_p5 = pneg %p2823_p2  ;;  %p2830_p9 = por %p2829_p6, %p2828_p13 }
  0xac   : > { %p2831_p11 = pnand %p2830_p9, %p2824_p5 }
  0xae   : > { %2834 = shalt.err (!%p2831_p11)
}
  0xaf   : > { %s2835_s13 = scalar_lea.vmem %s3577_s1, 256  ;;  %s3244_s4 = smov [#allocation19]  }
  0xb0   : > { %p2836_p7 = scmp.ne.s32.totalorder %s3577_s1, %s2835_s13  ;;  %s2840_s2 = sshll.u32 %s3244_s4, 4  ;;  %s2841_s2 = int_to_ptr.vmem [resolvable:$false] %s2840_s2 }
  0xb1   : > { %s2842_s21 = scalar_lea.vmem %s2841_s2, 512  ;;  %p2843_p4 = scmp.lt.s32.totalorder %s3577_s1, %s2841_s2 }
  0xb2   : > { %p2838_p12 = pnand %p2836_p7, %p3432_p8  ;;  %p2844_p2 = scmp.lt.s32.totalorder %s2842_s21, %s2835_s13 }
  0xb4   : > { %p2839_p0 = pneg %p2838_p12  ;;  %p2845_p1 = por %p2844_p2, %p2843_p4 }
  0xb6   : > { %p2846_p3 = pnand %p2845_p1, %p2839_p0 }
  0xb8   : > { %2849 = shalt.err (!%p2846_p3)
}
  0xb9   : > { %s4329_s9 = smov 64   ;;  %s2405_s5 = sshll.u32 %s3228_s22, 10 }
  0xba   : > { %2558 = dma.hbm_to_vmem [thread:$0]  (!%p4327_p10), %s3574_s3, 256, %s3577_s1, %s4278_s14, %s4329_s9, %s4329_s9, %s3241_s11  }
  0xbb   : > { %s4330_s12 = sld [smem:[#allocation57_spill]]  ;;  %s647_s13 = scalar_lea.vmem [#allocation22], %s2349_s16 }
  0xbc   : > { %s654_s4 = sshll.u32 %s647_s13, 4  ;;  %s4277_s2 = scalar_lea.sflag [#allocation23], %s3402_s25  ;;  %s3615_s4 = int_to_ptr.vmem [resolvable:$true] %s654_s4 }
  0xc1   : > { %s3611_s7 = scalar_lea.hbm %s4330_s12, %s2405_s5  ;;  %s2855_s5 = scalar_lea.hbm %s4330_s12, 2048 }
  0xc2   : > { %s2850_s21 = scalar_lea.hbm %s3611_s7, 1024  ;;  %p2856_p9 = scmp.lt.u32.totalorder %s3611_s7, %s4330_s12 }
  0xc3   : > { %p2851_p5 = scmp.ne.s32.totalorder %s3611_s7, %s2850_s21  ;;  %p2857_p11 = scmp.lt.u32.totalorder %s2855_s5, %s2850_s21 }
  0xc4   : > { %p2859_p12 = scmp.lt.u32.totalorder %s2850_s21, %s3611_s7 }
  0xc5   : > { %p2853_p13 = pnand %p2851_p5, %p3432_p8  ;;  %p2858_p7 = por %p2857_p11, %p2856_p9 }
  0xc7   : > { %p2854_p6 = pneg %p2853_p13  ;;  %p2860_p0 = por %p2859_p12, %p2858_p7 }
  0xc9   : > { %p2861_p4 = pnand %p2860_p0, %p2854_p6 }
  0xcb   : > { %2864 = shalt.err (!%p2861_p4)
}
  0xcc   : > { %s2865_s16 = scalar_lea.vmem %s3615_s4, 1024  ;;  %s3245_s13 = smov [#allocation22]  }
  0xcd   : > { %p2866_p2 = scmp.ne.s32.totalorder %s3615_s4, %s2865_s16  ;;  %s2870_s3 = sshll.u32 %s3245_s13, 4  ;;  %s2871_s3 = int_to_ptr.vmem [resolvable:$false] %s2870_s3 }
  0xce   : > { %s2872_s1 = scalar_lea.vmem %s2871_s3, 2048  ;;  %p2873_p5 = scmp.lt.s32.totalorder %s3615_s4, %s2871_s3 }
  0xcf   : > { %p2868_p1 = pnand %p2866_p2, %p3432_p8  ;;  %p2874_p13 = scmp.lt.s32.totalorder %s2872_s1, %s2865_s16 }
  0xd1   : > { %p2869_p3 = pneg %p2868_p1  ;;  %p2875_p9 = por %p2874_p13, %p2873_p5 }
  0xd3   : > { %p2876_p11 = pnand %p2875_p9, %p2869_p3 }
  0xd5   : > { %2879 = shalt.err (!%p2876_p11)
}
  0xd6   : > { %2564 = dma.hbm_to_vmem [thread:$0]  (!%p4327_p10), %s3611_s7, 1024, %s3615_s4, %s4277_s2, %s4329_s9, %s4329_s9, %s3241_s11  }
  0xd7   : > { %s3645_s21 = sadd.s32 4294967295, %s3236_s24   ;;  %s2328_s5 = sadd.s32 4294967294, %s3236_s24  }
  0xd8   : > { %s58_s28 = sadd.s32 1, %s3228_s22  ;;  %s4331_s6 = sld [smem:[#allocation34_spill]] }
  0xd9   : > { %p59_p6 = scmp.ge.s32.totalorder %s58_s28, 2  ;;  %s61_s16 = sadd.s32 1, %s3232_s23 }
  0xda   : > { %s68_s13 = sadd.s32 1, %s3216_s19  ;;  %p75_p7 = scmp.ne.s32.totalorder %s3216_s19, %s3212_s18 }
  0xdb   : > { %s4390_s28 = smov (%p59_p6, %s58_s28), 0  ;;  %s4392_s16 = smov (!%p59_p6, %s61_s16), %s3232_s23 }
  0xdc   : > { %4332 = sst [smem:[#allocation42_spill]] %s4390_s28  ;;  %p4333_p12 = scmp.eq.s32.totalorder %s3236_s24, 0 }
  0xdd   : > { %p81_p4 = scmp.ne.s32.totalorder %s3212_s18, %s3208_s17  ;;  %p63_p2 = scmp.ge.s32.totalorder %s4392_s16, 2 }
  0xde   : > { %p3661_p0 = por %p4333_p12, %p75_p7  ;;  %p82_p1 = scmp.eq.s32.totalorder %s3645_s21, 0 }
  0xdf   : > { %s91_s9 = ssub.s32 %s3228_s22, %s4390_s28  ;;  %s94_s7 = sadd.s32 1, %s3204_s0 }
  0xe0   : > { %s4394_s16 = smov (%p63_p2, %s4392_s16), 0  ;;  %p3676_p3 = por %p82_p1, %p81_p4 }
  0xe1   : > { %4335 = sst [smem:[#allocation43_spill]] %s4394_s16  ;;  %p92_p5 = scmp.eq.s32.totalorder %s91_s9, 0 }
  0xe2   : > { %s4336_s4 = scalar_select %p3676_p3, 1, 0 }
  0xe3   : > { %s65_s3 = ssub.s32 %s3232_s23, %s4394_s16  ;;  %p107_p13 = scmp.ne.s32.totalorder %s4331_s6, %s3196_s15 }
  0xe4   : > { %p66_p9 = scmp.eq.s32.totalorder %s65_s3, 0  ;;  %p417_p11 = scmp.eq.s32.totalorder %s3645_s21, 3 }
  0xe5   : > { %s3686_s1 = scalar_select %p92_p5, %s3204_s0, %s94_s7  }
  0xe6   : > { %s3689_s2 = scalar_select %p66_p9, %s3216_s19, %s68_s13  }
  0xe7   : > { %4337 = sst [smem:[#allocation44_spill]] %s3686_s1  ;;  %p3691_p6 = por %p107_p13, %p82_p1 }
  0xe8   : > { %4338 = sst [smem:[#allocation45_spill]] %s3689_s2  ;;  %p3698_p12 = por %p417_p11, %p75_p7 }
  0xe9   : > { %s4339_s14 = scalar_select %p3691_p6, 1, 0 }
  0xea   : > { %s4340_s30 = scalar_select %p3698_p12, 1, 0 }
  0xeb   : > { %p423_p2 = scmp.eq.s32.totalorder %s2328_s5, 3  ;;  %s443_s15 = sand.u32 1, %s3216_s19  }
  0xec   : > { %s2331_s6 = sshll.u32 %s443_s15, 2  ;;  %s2332_s7 = sshll.u32 %s3232_s23, 6 }
  0xed   : > { %p3706_p3 = por %p423_p2, %p81_p4  ;;  %s447_s13 = scalar_lea.vmem [#allocation4], %s2331_s6 }
  0xee   : > { %s454_s3 = sshll.u32 %s447_s13, 4  ;;  %s4342_s12 = sld [smem:[#allocation46_spill]]  ;;  %s3716_s3 = int_to_ptr.vmem [resolvable:$true] %s454_s3 }
  0xef   : > { %s4341_s9 = scalar_select %p3706_p3, 1, 0 }
  0xf0   : > { %p4343_p7 = scmp.lt.s32.totalorder %s3236_s24, 4  ;;  %s4345_s13 = sld [smem:[#allocation48_spill]] }
  0xf1   : > { %s481_s10 = scalar_lea.vmem [#allocation9], %s3405_s26  ;;  %s444_s23 = scalar_lea.sflag [#allocation5], %s443_s15 }
  0xf2   : > { %p3722_p4 = pnand %p4343_p7, %p3661_p0 }
  0xf4   : > { %s3714_s16 = scalar_lea.hbm %s4342_s12, %s2332_s7  ;;  %s488_s7 = sshll.u32 %s481_s10, 4  ;;  %s3733_s7 = int_to_ptr.vmem [resolvable:$true] %s488_s7 }
  0xf5   : > { %s2880_s22 = scalar_lea.hbm %s3714_s16, 64  ;;  %p2882_p5 = pneg %p3722_p4 }
  0xf6   : > { %s3730_s8 = scalar_lea.hbm %s4345_s13, %s3408_s27  ;;  %p2881_p1 = scmp.ne.s32.totalorder %s3714_s16, %s2880_s22 }
  0xf7   : > { %s2885_s28 = scalar_lea.hbm %s4342_s12, 128  ;;  %p2886_p9 = scmp.lt.u32.totalorder %s3714_s16, %s4342_s12 }
  0xf8   : > { %p2883_p0 = pnand %p2882_p5, %p2881_p1  ;;  %p2887_p11 = scmp.lt.u32.totalorder %s2885_s28, %s2880_s22 }
  0xf9   : > { %p2889_p7 = scmp.lt.u32.totalorder %s2880_s22, %s3714_s16 }
  0xfa   : > { %p2884_p13 = pneg %p2883_p0  ;;  %p2888_p2 = por %p2887_p11, %p2886_p9 }
  0xfc   : > { %p2890_p3 = por %p2889_p7, %p2888_p2 }
  0xfe   : > { %p2891_p12 = pnand %p2890_p3, %p2884_p13 }
 0x100   : > { %2894 = shalt.err (!%p2891_p12)
}
 0x101   : > { %s2895_s15 = scalar_lea.vmem %s3716_s3, 64  ;;  %s3246_s2 = smov [#allocation4]  }
 0x102   : > { %p2896_p1 = scmp.ne.s32.totalorder %s3716_s3, %s2895_s15  ;;  %s2900_s10 = sshll.u32 %s3246_s2, 4  ;;  %s2901_s10 = int_to_ptr.vmem [resolvable:$false] %s2900_s10 }
 0x103   : > { %s2902_s19 = scalar_lea.vmem %s2901_s10, 128  ;;  %p2903_p10 = scmp.lt.s32.totalorder %s3716_s3, %s2901_s10 }
 0x104   : > { %p2898_p0 = pnand %p2896_p1, %p2882_p5  ;;  %p2904_p9 = scmp.lt.s32.totalorder %s2902_s19, %s2895_s15 }
 0x106   : > { %p2899_p6 = pneg %p2898_p0  ;;  %p2905_p11 = por %p2904_p9, %p2903_p10 }
 0x108   : > { %p2906_p2 = pnand %p2905_p11, %p2899_p6 }
 0x10a   : > { %2909 = shalt.err (!%p2906_p2)
}
 0x10b   : > { %2531 = dma.hbm_to_vmem [thread:$0]  (!%p3722_p4), %s3714_s16, 64, %s3716_s3, %s444_s23  }
 0x10c   : > { %s2910_s22 = scalar_lea.hbm %s3730_s8, 16  ;;  %s2915_s6 = scalar_lea.hbm %s4345_s13, 32 }
 0x10d   : > { %p2911_p3 = scmp.ne.s32.totalorder %s3730_s8, %s2910_s22  ;;  %p2916_p10 = scmp.lt.u32.totalorder %s3730_s8, %s4345_s13 }
 0x10e   : > { %p2917_p6 = scmp.lt.u32.totalorder %s2915_s6, %s2910_s22  ;;  %p2919_p7 = scmp.lt.u32.totalorder %s2910_s22, %s3730_s8 }
 0x10f   : > { %p2913_p12 = pnand %p2911_p3, %p3432_p8 }
 0x110   : > { %p2918_p13 = por %p2917_p6, %p2916_p10 }
 0x111   : > { %p2914_p5 = pneg %p2913_p12 }
 0x112   : > { %p2920_p1 = por %p2919_p7, %p2918_p13 }
 0x114   : > { %p2921_p0 = pnand %p2920_p1, %p2914_p5 }
 0x116   : > { %2924 = shalt.err (!%p2921_p0)
}
 0x117   : > { %s2925_s23 = scalar_lea.vmem %s3733_s7, 16  ;;  %s3247_s16 = smov [#allocation9]  }
 0x118   : > { %p2926_p4 = scmp.ne.s32.totalorder %s3733_s7, %s2925_s23  ;;  %s2930_s3 = sshll.u32 %s3247_s16, 4  ;;  %s2931_s3 = int_to_ptr.vmem [resolvable:$false] %s2930_s3 }
 0x119   : > { %s2932_s5 = scalar_lea.vmem %s2931_s3, 32  ;;  %p2933_p2 = scmp.lt.s32.totalorder %s3733_s7, %s2931_s3 }
 0x11a   : > { %p2928_p9 = pnand %p2926_p4, %p3432_p8  ;;  %p2934_p3 = scmp.lt.s32.totalorder %s2932_s5, %s2925_s23 }
 0x11c   : > { %p2929_p11 = pneg %p2928_p9  ;;  %p2935_p12 = por %p2934_p3, %p2933_p2 }
 0x11e   : > { %p2936_p10 = pnand %p2935_p12, %p2929_p11 }
 0x120   : > { %2939 = shalt.err (!%p2936_p10)
}
 0x121   : > { %p4346_p5 = scmp.ne.s32.totalorder %s4317_s20, 0  ;;  %s4347_s10 = scalar_lea.sflag [#allocation8], %s3402_s25 }
 0x122   : > { %s4348_s11 = sld [smem:[#allocation50_spill]]  ;;  %s519_s6 = scalar_lea.vmem [#allocation12], %s3405_s26 }
 0x123   : > { %2537 = dma.hbm_to_vmem [thread:$0]  (!%p4346_p5), %s3730_s8, 16, %s3733_s7, %s4347_s10  }
 0x124   : > { %s526_s15 = sshll.u32 %s519_s6, 4  ;;  %s4349_s16 = sld [smem:[#allocation52_spill]]  ;;  %s527_s15 = int_to_ptr.vmem [resolvable:$true] %s526_s15 }
 0x128   : > { %s3787_s28 = scalar_lea.hbm %s4348_s11, %s3408_s27  ;;  %s2945_s10 = scalar_lea.hbm %s4348_s11, 32 }
 0x129   : > { %s2940_s12 = scalar_lea.hbm %s3787_s28, 16  ;;  %p2946_p1 = scmp.lt.u32.totalorder %s3787_s28, %s4348_s11 }
 0x12a   : > { %s4350_s3 = smov %s4349_s16  ;;  %s3794_s5 = scalar_lea.hbm %s4349_s16, %s3408_s27 }
 0x12b   : > { %p2941_p6 = scmp.ne.s32.totalorder %s3787_s28, %s2940_s12  ;;  %p2947_p0 = scmp.lt.u32.totalorder %s2945_s10, %s2940_s12 }
 0x12c   : > { %p2949_p9 = scmp.lt.u32.totalorder %s2940_s12, %s3787_s28 }
 0x12d   : > { %p2943_p13 = pnand %p2941_p6, %p3432_p8  ;;  %p2948_p4 = por %p2947_p0, %p2946_p1 }
 0x12f   : > { %p2944_p7 = pneg %p2943_p13  ;;  %p2950_p11 = por %p2949_p9, %p2948_p4 }
 0x131   : > { %p2951_p2 = pnand %p2950_p11, %p2944_p7 }
 0x133   : > { %2954 = shalt.err (!%p2951_p2)
}
 0x134   : > { %s2955_s6 = scalar_lea.vmem %s527_s15, 16  ;;  %s3248_s2 = smov [#allocation12]  }
 0x135   : > { %p2956_p3 = scmp.ne.s32.totalorder %s527_s15, %s2955_s6  ;;  %s2960_s23 = sshll.u32 %s3248_s2, 4  ;;  %s2961_s23 = int_to_ptr.vmem [resolvable:$false] %s2960_s23 }
 0x136   : > { %s2962_s16 = scalar_lea.vmem %s2961_s23, 32  ;;  %p2963_p6 = scmp.lt.s32.totalorder %s527_s15, %s2961_s23 }
 0x137   : > { %p2958_p12 = pnand %p2956_p3, %p3432_p8  ;;  %p2964_p13 = scmp.lt.s32.totalorder %s2962_s16, %s2955_s6 }
 0x139   : > { %p2959_p10 = pneg %p2958_p12  ;;  %p2965_p5 = por %p2964_p13, %p2963_p6 }
 0x13b   : > { %p2966_p0 = pnand %p2965_p5, %p2959_p10 }
 0x13d   : > { %2969 = shalt.err (!%p2966_p0)
}
 0x13e   : > { %p4351_p1 = scmp.ne.s32.totalorder %s4317_s20, 0  ;;  %s4352_s12 = scalar_lea.sflag [#allocation11], %s3402_s25 }
 0x13f   : > { %s557_s8 = scalar_lea.vmem [#allocation15], %s3405_s26  ;;  %s4353_s22 = sld [smem:[#allocation54_spill]] }
 0x140   : > { %2543 = dma.hbm_to_vmem [thread:$0]  (!%p4351_p1), %s3787_s28, 16, %s527_s15, %s4352_s12  }
 0x141   : > { %s564_s7 = sshll.u32 %s557_s8, 4  ;;  %s2970_s23 = scalar_lea.hbm %s3794_s5, 16  ;;  %s565_s7 = int_to_ptr.vmem [resolvable:$true] %s564_s7 }
 0x142   : > { %p2971_p5 = scmp.ne.s32.totalorder %s3794_s5, %s2970_s23  ;;  %s2975_s13 = scalar_lea.hbm %s4350_s3, 32 }
 0x143   : > { %p2976_p9 = scmp.lt.u32.totalorder %s3794_s5, %s4350_s3  ;;  %p2977_p11 = scmp.lt.u32.totalorder %s2975_s13, %s2970_s23 }
 0x144   : > { %p2973_p7 = pnand %p2971_p5, %p3432_p8  ;;  %p2979_p3 = scmp.lt.u32.totalorder %s2970_s23, %s3794_s5 }
 0x145   : > { %s4354_s6 = smov %s4353_s22  ;;  %s3820_s2 = scalar_lea.hbm %s4353_s22, %s3408_s27 }
 0x146   : > { %p2974_p4 = pneg %p2973_p7  ;;  %p2978_p2 = por %p2977_p11, %p2976_p9 }
 0x148   : > { %p2980_p12 = por %p2979_p3, %p2978_p2 }
 0x14a   : > { %p2981_p10 = pnand %p2980_p12, %p2974_p4 }
 0x14c   : > { %2984 = shalt.err (!%p2981_p10)
}
 0x14d   : > { %s2985_s28 = scalar_lea.vmem %s565_s7, 16  ;;  %s3249_s15 = smov [#allocation15]  }
 0x14e   : > { %p2986_p6 = scmp.ne.s32.totalorder %s565_s7, %s2985_s28  ;;  %s2990_s12 = sshll.u32 %s3249_s15, 4  ;;  %s2991_s12 = int_to_ptr.vmem [resolvable:$false] %s2990_s12 }
 0x14f   : > { %s2992_s11 = scalar_lea.vmem %s2991_s12, 32  ;;  %p2993_p5 = scmp.lt.s32.totalorder %s565_s7, %s2991_s12 }
 0x150   : > { %p2988_p13 = pnand %p2986_p6, %p3432_p8  ;;  %p2994_p7 = scmp.lt.s32.totalorder %s2992_s11, %s2985_s28 }
 0x152   : > { %p2989_p0 = pneg %p2988_p13  ;;  %p2995_p1 = por %p2994_p7, %p2993_p5 }
 0x154   : > { %p2996_p9 = pnand %p2995_p1, %p2989_p0 }
 0x156   : > { %2999 = shalt.err (!%p2996_p9)
}
 0x157   : > { %p4355_p11 = scmp.ne.s32.totalorder %s4317_s20, 0  ;;  %s4356_s0 = scalar_lea.sflag [#allocation14], %s3402_s25 }
 0x158   : > { %s591_s1 = scalar_lea.vmem [#allocation18], %s3405_s26  ;;  %s4357_s19 = sld [smem:[#allocation56_spill]] }
 0x159   : > { %2549 = dma.hbm_to_vmem [thread:$0]  (!%p4355_p11), %s3794_s5, 16, %s565_s7, %s4356_s0  }
 0x15a   : > { %s598_s13 = sshll.u32 %s591_s1, 4  ;;  %s3000_s23 = scalar_lea.hbm %s3820_s2, 16  ;;  %s599_s13 = int_to_ptr.vmem [resolvable:$true] %s598_s13 }
 0x15b   : > { %p3001_p1 = scmp.ne.s32.totalorder %s3820_s2, %s3000_s23  ;;  %s3005_s12 = scalar_lea.hbm %s4354_s6, 32 }
 0x15c   : > { %p3006_p3 = scmp.lt.u32.totalorder %s3820_s2, %s4354_s6  ;;  %p3007_p12 = scmp.lt.u32.totalorder %s3005_s12, %s3000_s23 }
 0x15d   : > { %p3003_p4 = pnand %p3001_p1, %p3432_p8  ;;  %p3009_p6 = scmp.lt.u32.totalorder %s3000_s23, %s3820_s2 }
 0x15e   : > { %s4358_s28 = smov %s4357_s19  ;;  %s3846_s22 = scalar_lea.hbm %s4357_s19, %s3408_s27 }
 0x15f   : > { %p3004_p2 = pneg %p3003_p4  ;;  %p3008_p10 = por %p3007_p12, %p3006_p3 }
 0x161   : > { %p3010_p13 = por %p3009_p6, %p3008_p10 }
 0x163   : > { %p3011_p0 = pnand %p3010_p13, %p3004_p2 }
 0x165   : > { %3014 = shalt.err (!%p3011_p0)
}
 0x166   : > { %s3015_s5 = scalar_lea.vmem %s599_s13, 16  ;;  %s3250_s7 = smov [#allocation18]  }
 0x167   : > { %p3016_p5 = scmp.ne.s32.totalorder %s599_s13, %s3015_s5  ;;  %s3020_s0 = sshll.u32 %s3250_s7, 4  ;;  %s3021_s0 = int_to_ptr.vmem [resolvable:$false] %s3020_s0 }
 0x168   : > { %s3022_s1 = scalar_lea.vmem %s3021_s0, 32  ;;  %p3023_p1 = scmp.lt.s32.totalorder %s599_s13, %s3021_s0 }
 0x169   : > { %p3018_p7 = pnand %p3016_p5, %p3432_p8  ;;  %p3024_p4 = scmp.lt.s32.totalorder %s3022_s1, %s3015_s5 }
 0x16b   : > { %p3019_p9 = pneg %p3018_p7  ;;  %p3025_p11 = por %p3024_p4, %p3023_p1 }
 0x16d   : > { %p3026_p3 = pnand %p3025_p11, %p3019_p9 }
 0x16f   : > { %3029 = shalt.err (!%p3026_p3)
}
 0x170   : > { %p4359_p12 = scmp.ne.s32.totalorder %s4317_s20, 0  ;;  %s4360_s3 = scalar_lea.sflag [#allocation17], %s3402_s25 }
 0x171   : > { %s629_s8 = scalar_lea.vmem [#allocation21], %s3405_s26  ;;  %s4361_s16 = sld [smem:[#allocation58_spill]] }
 0x172   : > { %2555 = dma.hbm_to_vmem [thread:$0]  (!%p4359_p12), %s3820_s2, 16, %s599_s13, %s4360_s3  }
 0x173   : > { %s636_s10 = sshll.u32 %s629_s8, 4  ;;  %s3030_s11 = scalar_lea.hbm %s3846_s22, 16  ;;  %s637_s10 = int_to_ptr.vmem [resolvable:$true] %s636_s10 }
 0x174   : > { %p3031_p11 = scmp.ne.s32.totalorder %s3846_s22, %s3030_s11  ;;  %s3035_s0 = scalar_lea.hbm %s4358_s28, 32 }
 0x175   : > { %p3036_p6 = scmp.lt.u32.totalorder %s3846_s22, %s4358_s28  ;;  %p3037_p13 = scmp.lt.u32.totalorder %s3035_s0, %s3030_s11 }
 0x176   : > { %p3033_p2 = pnand %p3031_p11, %p3432_p8  ;;  %p3039_p5 = scmp.lt.u32.totalorder %s3030_s11, %s3846_s22 }
 0x177   : > { %s4362_s12 = smov %s4361_s16  ;;  %s3872_s15 = scalar_lea.hbm %s4361_s16, %s3408_s27 }
 0x178   : > { %p3034_p10 = pneg %p3033_p2  ;;  %p3038_p0 = por %p3037_p13, %p3036_p6 }
 0x17a   : > { %p3040_p7 = por %p3039_p5, %p3038_p0 }
 0x17c   : > { %p3041_p9 = pnand %p3040_p7, %p3034_p10 }
 0x17e   : > { %3044 = shalt.err (!%p3041_p9)
}
 0x17f   : > { %s3045_s27 = scalar_lea.vmem %s637_s10, 16  ;;  %s3251_s2 = smov [#allocation21]  }
 0x180   : > { %p3046_p1 = scmp.ne.s32.totalorder %s637_s10, %s3045_s27  ;;  %s3050_s13 = sshll.u32 %s3251_s2, 4  ;;  %s3051_s13 = int_to_ptr.vmem [resolvable:$false] %s3050_s13 }
 0x181   : > { %s3052_s3 = scalar_lea.vmem %s3051_s13, 32  ;;  %p3053_p11 = scmp.lt.s32.totalorder %s637_s10, %s3051_s13 }
 0x182   : > { %p3048_p4 = pnand %p3046_p1, %p3432_p8  ;;  %p3054_p2 = scmp.lt.s32.totalorder %s3052_s3, %s3045_s27 }
 0x184   : > { %p3049_p3 = pneg %p3048_p4  ;;  %p3055_p12 = por %p3054_p2, %p3053_p11 }
 0x186   : > { %p3056_p6 = pnand %p3055_p12, %p3049_p3 }
 0x188   : > { %3059 = shalt.err (!%p3056_p6)
}
 0x189   : > { %p4363_p13 = scmp.ne.s32.totalorder %s4317_s20, 0  ;;  %s4364_s6 = scalar_lea.sflag [#allocation20], %s3402_s25 }
 0x18a   : > { %s667_s8 = scalar_lea.vmem [#allocation24], %s3405_s26  ;;  %s3060_s23 = scalar_lea.hbm %s3872_s15, 16 }
 0x18b   : > { %2561 = dma.hbm_to_vmem [thread:$0]  (!%p4363_p13), %s3846_s22, 16, %s637_s10, %s4364_s6  }
 0x18c   : > { %s674_s19 = sshll.u32 %s667_s8, 4  ;;  %p3061_p10 = scmp.ne.s32.totalorder %s3872_s15, %s3060_s23  ;;  %s675_s19 = int_to_ptr.vmem [resolvable:$true] %s674_s19 }
 0x18d   : > { %s3065_s5 = scalar_lea.hbm %s4362_s12, 32  ;;  %p3066_p5 = scmp.lt.u32.totalorder %s3872_s15, %s4362_s12 }
 0x18e   : > { %p3063_p12 = pnand %p3061_p10, %p3432_p8  ;;  %p3067_p7 = scmp.lt.u32.totalorder %s3065_s5, %s3060_s23 }
 0x18f   : > { %p3069_p1 = scmp.lt.u32.totalorder %s3060_s23, %s3872_s15 }
 0x190   : > { %p3064_p0 = pneg %p3063_p12  ;;  %p3068_p9 = por %p3067_p7, %p3066_p5 }
 0x192   : > { %p3070_p4 = por %p3069_p1, %p3068_p9 }
 0x194   : > { %p3071_p3 = pnand %p3070_p4, %p3064_p0 }
 0x196   : > { %3074 = shalt.err (!%p3071_p3)
}
 0x197   : > { %s3075_s26 = scalar_lea.vmem %s675_s19, 16  ;;  %s3252_s22 = smov [#allocation24]  }
 0x198   : > { %p3076_p11 = scmp.ne.s32.totalorder %s675_s19, %s3075_s26  ;;  %s3080_s10 = sshll.u32 %s3252_s22, 4  ;;  %s3081_s10 = int_to_ptr.vmem [resolvable:$false] %s3080_s10 }
 0x199   : > { %s3082_s1 = scalar_lea.vmem %s3081_s10, 32  ;;  %p3083_p10 = scmp.lt.s32.totalorder %s675_s19, %s3081_s10 }
 0x19a   : > { %p3078_p2 = pnand %p3076_p11, %p3432_p8  ;;  %p3084_p12 = scmp.lt.s32.totalorder %s3082_s1, %s3075_s26 }
 0x19c   : > { %p3079_p6 = pneg %p3078_p2  ;;  %p3085_p13 = por %p3084_p12, %p3083_p10 }
 0x19e   : > { %p3086_p5 = pnand %p3085_p13, %p3079_p6 }
 0x1a0   : > { %3089 = shalt.err (!%p3086_p5)
}
 0x1a1   : > { %p4365_p7 = scmp.ne.s32.totalorder %s4317_s20, 0  ;;  %s4366_s27 = scalar_lea.sflag [#allocation23], %s3402_s25 }
 0x1a2   : > { %s4367_s2 = sld [smem:[#allocation41_spill]] }
 0x1a3   : > { %2567 = dma.hbm_to_vmem [thread:$0]  (!%p4365_p7), %s3872_s15, 16, %s675_s19, %s4366_s27  }
 0x1a8   : > { %p4368_p0 = scmp.ne.s32.totalorder %s4367_s2, 0 }
 0x1a9   : > { %s3916_s29 = sand.u32 (!%p4368_p0), 1, %s3212_s18   ;;  %p4369_p8 = scmp.ne.s32.totalorder (!%p4368_p0), %s4336_s4, 0 }
 0x1aa   : > { %683 = sbr.rel (%p4368_p0) target bundleno = 3166 (0xc5e), region = 72  ;;  %s2354_s13 = sshll.u32 (!%p4368_p0), %s3916_s29, 2 }
 0x1ab   : > { %s686_s3 = scalar_lea.sflag (!%p4368_p0), [#allocation5], %s3916_s29  ;;  %s3922_s6 = scalar_lea.vmem (!%p4368_p0), [#allocation4], %s2354_s13 }
 0x1b1   : > { %3163 = dma.done.wait (%p4369_p8), %s686_s3, 64  }
 0x1b2   : > { %3165 = vsyncadd (%p4369_p8), %s686_s3, 4294967232  ;;  %s4370_s20 = sld [smem:[#allocation34_spill]]  ;;  %s3929_s25 = sand.u32 1, %s3645_s21  }
 0x1b3   : > { %s695_s8 = scalar_lea.sflag [#allocation8], %s3929_s25  ;;  %p4371_p13 = scmp.ne.s32.totalorder %s4339_s14, 0 }
 0x1b8   : > { %s3932_s15 = sand.u32 1, %s4370_s20  }
 0x1b9   : > { %s697_s19 = scalar_lea.vmem [#allocation7], %s3932_s15 }
 0x1ba   : > { %3167 = dma.done.wait (%p4371_p13), %s695_s8, 32  }
 0x1bb   : > { %3169 = vsyncadd (%p4371_p13), %s695_s8, 4294967264  ;;  %s3941_s4 = sshll.u32 %s3932_s15, 4  ;;  %s705_s21 = scalar_lea.vmem [#allocation9], %s3932_s15 }
 0x1bc   : > { %s711_s23 = scalar_lea.sflag [#allocation11], %s3929_s25  ;;  %s714_s16 = scalar_lea.vmem [#allocation10], %s3941_s4 }
 0x1bd   : > { %3171 = dma.done.wait (%p4371_p13), %s711_s23, 272  }
 0x1be   : > { %3173 = vsyncadd (%p4371_p13), %s711_s23, 4294967024  ;;  %s722_s11 = scalar_lea.vmem [#allocation12], %s3932_s15  ;;  %s728_s5 = scalar_lea.sflag [#allocation14], %s3929_s25 }
 0x1bf   : > { %s731_s7 = scalar_lea.vmem [#allocation13], %s3941_s4 }
 0x1c0   : > { %3175 = dma.done.wait (%p4371_p13), %s728_s5, 272  }
 0x1c1   : > { %3177 = vsyncadd (%p4371_p13), %s728_s5, 4294967024  ;;  %s739_s0 = scalar_lea.vmem [#allocation15], %s3932_s15  ;;  %s745_s26 = scalar_lea.sflag [#allocation17], %s3929_s25 }
 0x1c2   : > { %s747_s22 = scalar_lea.vmem [#allocation16], %s3932_s15 }
 0x1c3   : > { %3179 = dma.done.wait (%p4371_p13), %s745_s26, 32  }
 0x1c4   : > { %3181 = vsyncadd (%p4371_p13), %s745_s26, 4294967264  ;;  %s755_s10 = scalar_lea.vmem [#allocation18], %s3932_s15  ;;  %s761_s1 = scalar_lea.sflag [#allocation20], %s3929_s25 }
 0x1c5   : > { %s764_s27 = scalar_lea.vmem [#allocation19], %s3941_s4 }
 0x1c6   : > { %3183 = dma.done.wait (%p4371_p13), %s761_s1, 272  }
 0x1c7   : > { %3185 = vsyncadd (%p4371_p13), %s761_s1, 4294967024  ;;  %s2358_s2 = sshll.u32 %s3932_s15, 6  ;;  %s772_s3 = scalar_lea.vmem [#allocation21], %s3932_s15 }
 0x1c8   : > { %s778_s20 = scalar_lea.sflag [#allocation23], %s3929_s25  ;;  %s3974_s8 = scalar_lea.vmem [#allocation22], %s2358_s2 }
 0x1c9   : > { %3187 = dma.done.wait (%p4371_p13), %s778_s20, 1040  }
 0x1ca   : > { %3189 = vsyncadd (%p4371_p13), %s778_s20, 4294966256  ;;  %s789_s23 = scalar_lea.vmem [#allocation24], %s3932_s15  ;;  %s3983_s5 = scalar_lea.vmem [#allocation25], %s2354_s13 }
 0x1cb   : > { %s4372_s26 = sld [smem:[#allocation37_spill]] }
 0x1d1   : > { %p2360_p9 = scmp.ne.s32.totalorder %s4372_s26, 0 }
 0x1d2   : > { %v889_v0 = vld [vmem:[%s3922_s6] sm:$0xf] (!%p2360_p9)  ;;  %vm890_vm0 = vcmask (!%p2360_p9), 257024  }
 0x1d3   : > { %888 = sbr.rel (%p2360_p9) target bundleno = 474 (0x1da), region = 128  ;;  %891 = vst.msk [vmem:[%s3983_s5] sm:$0xf] (!%p2360_p9), %vm890_vm0, %v889_v0 }
 0x1da PF: > { %v892_v1 = vld [vmem:[%s3983_s5] sm:$0xf]  ;;  %vm905_vm1 = vcmask 261120   ;;  %v3253_v10 = vmov 0.0   ;;  %vm3254_vm2 = vmmov 0   ;;  %s3255_s14 = smov 112   ;;  %v895_v29 = vlaneseq }
 0x1db   : > { %v3989_v2 = vunpack.c.l.bf16 %v892_v1  ;;  %v2672_v9 = vld [vmem:[%s714_s16] sm:$0xff]   ;;  %2432 = vmatprep.subr.bf16.mxu0 %v3253_v10  ;;  %2436 = vmatprep.mubr.msk.bf16.mxu0 %vm3254_vm2, %v3253_v10  ;;  %v2673_v11 = vld [vmem:[%s714_s16 + $0x8] sm:$0xff]   ;;  %s3256_s13 = smov 96   ;;  %v3257_v30 = vmov 1983009808   ;;  %vm1371_vm3 = vcmask 130048  }
 0x1dc   : > { %2433 = vmatpush3.bf16.msra.mxu0 %v2672_v9  ;;  %2452 = vmatprep.subr.bf16.mxu1 %v3253_v10  ;;  %v2361_v16 = vld [vmem:[%s697_s19] ss:$0 sm:$0xff]  ;;  %v1007_v31 = vunpack.c.l.s4 %v3257_v30  ;;  %v4024_v32 = vshrl.u32 %v895_v29, 7  ;;  %v3258_v37 = vmov 1934713408   ;;  %s894_s6 = sld [smem:[#allocation3]] }
 0x1dd   : > { %v906_v3 = vsel %vm905_vm1, %v3989_v2, 0.0  ;;  %2434 = vmatprep.subr.bf16.mxu0 %v3253_v10  ;;  %2454 = vmatprep.mubr.msk.bf16.mxu1 %vm3254_vm2, %v3253_v10  ;;  %v2362_v18 = vld [vmem:[%s705_s21] ss:$0 sm:$0xff]  ;;  %v1038_v38 = vunpack.c.l.s4 %v3258_v37  ;;  %vm1470_vm7 = vcmask 64512   ;;  %s3259_s25 = smov 64   ;;  %vm1498_vm8 = vcmask 1043456  }
 0x1de   : > { %907 = vadd.xlane.f32.xlu0 %v906_v3  ;;  %v2363_v22 = vld [vmem:[%s722_s11] ss:$0 sm:$0xff]  ;;  %v1008_v33 = vunpack.c.0.s8 %v1007_v31  ;;  %s3260_s19 = smov 16   ;;  %s4373_s4 = sld [smem:[#allocation38_spill]]  ;;  %vm1996_vm9 = vcmask 257024  }
 0x1df   : > { %v1039_v40 = vunpack.c.0.s8 %v1038_v38  ;;  %s2012_s16 = sshll.u32 %s3983_s5, 4  ;;  %s1999_s15 = scalar_lea.sflag [#allocation6], %s3916_s29  ;;  %s4182_s16 = int_to_ptr.vmem [resolvable:$true] %s2012_s16 }
 0x1e0   : > { %2435 = vmatpush3.bf16.msra.mxu0 %v2673_v11  ;;  %v4031_v36 = vsub.s32 %v1008_v33, %v4024_v32  ;;  %s3090_s1 = scalar_lea.vmem %s4182_s16, 64  ;;  %p4376_p4 = scmp.ne.s32.totalorder %s4340_s30, 0 }
 0x1e1   : > { %2440 = vmatprep.subr.bf16.mxu0 %v3253_v10  ;;  %v4041_v48 = vsub.s32 %v1039_v40, %v4024_v32  ;;  %p3091_p1 = scmp.ne.s32.totalorder %s4182_s16, %s3090_s1 }
 0x1e3   : > { %p3092_p3 = pnand %p3091_p1, %p4376_p4 }
 0x1e4   : > { %s2399_s21 = sshll.u32 %s4373_s4, 6 }
 0x1e5   : > { %p3093_p11 = pneg %p3092_p3 }
 0x26b   : > { %v908_v4 = vpop.xlane.xlu0 %907 }
 0x26c   : > { %v910_v5 = vmul.f32 0.03125, %v908_v4 }
 0x26e   : > { %v911_v6 = vsub.f32 %v3989_v2, %v910_v5 }
 0x270   : > { %v912_v7 = vmul.f32 %v911_v6, %v911_v6 }
 0x272   : > { %v913_v8 = vsel %vm905_vm1, %v912_v7, 0.0 }
 0x273   : > { %914 = vadd.xlane.f32.xlu0 %v913_v8 }
 0x300   : > { %v915_v12 = vpop.xlane.xlu0 %914 }
 0x301   : > { %v916_v13 = vmul.f32 0.03125, %v915_v12 }
 0x303   : > { %v917_v14 = vadd.f32 1e-05, %v916_v13 }
 0x305   : > { %2686 = vrsqrt.f32 %v917_v14 }
 0x30f   : > { %v2687_v15 = vpop.eup %2686 }
 0x310   : > { %v919_v17 = vmul.f32 %v2687_v15, %v911_v6 }
 0x312   : > { %v926_v19 = vmul.f32 %v2361_v16, %v919_v17 }
 0x314   : > { %v933_v20 = vadd.f32 %v2362_v18, %v926_v19 }
 0x316   : > { %v934_v21 = vpack.c.bf16 %v933_v20, %v933_v20 }
 0x318   : > { %2437 = vmatmul.mubr.msk.bf16.vlgmr.msra.gmra.mrb[0].mxu0 %vm905_vm1, %v934_v21 }
 0x319   : > { %2442 = vmatprep.mubr.msk.bf16.mxu0 %vm3254_vm2, %v3253_v10 }
 0x3eb   : > { %v995_v23 = vpop.f32.mrb[0].mxu0 }
 0x3ec   : > { %v4016_v24 = vadd.f32 %v2363_v22, %v995_v23  ;;  %v2438_v25 = vpop.f32.mrb[1].mxu0 }
 0x3ed   : > { %v998_v26 = vpop.f32.mrb[2].mxu0 }
 0x3ee   : > { %1002 = vrot.lane.b32.xlu1 %v4016_v24, %s3255_s14  ;;  %v2439_v27 = vpop.f32.mrb[3].mxu0  ;;  %v1005_v35 = vcombine.high %v4016_v24, %v3253_v10  ;;  %v1012_v44 = vrot.slane %v4016_v24, %v4031_v36 }
 0x3f0   : > { %v1019_v41 = vrot.slane %v1005_v35, %v4031_v36 }
 0x3f2   : > { %1123 = vrot.lane.b32.xlu1 %v4016_v24, %s3256_s13 }
 0x460   : > { %v4020_v28 = vpop.permute.xlu1 %1002 }
 0x461   : > { %1125 = vrot.lane.b32.xlu0 %v4020_v28, %s3256_s13  ;;  %v1020_v34 = vcombine.high %v4020_v28, %v3253_v10  ;;  %v1027_v42 = vrot.slane %v4020_v28, %v4031_v36 }
 0x463   : > { %v1034_v39 = vrot.slane %v1020_v34, %v4031_v36  ;;  %v1035_v49 = vcombine.low %v1012_v44, %v1027_v42  ;;  %v1036_v50 = vcombine.high %v1012_v44, %v1027_v42 }
 0x464   : > { %v1124_v43 = vpop.permute.xlu1 %1123 }
 0x465   : > { %v1051_v45 = vcombine.low %v1019_v41, %v1034_v39  ;;  %v1052_v46 = vcombine.high %v1019_v41, %v1034_v39  ;;  %v1129_v47 = vcombine.high %v1124_v43, %v3253_v10  ;;  %v1136_v52 = vrot.slane %v1124_v43, %v4031_v36 }
 0x466   : > { %v1043_v61 = vrot.slane %v1035_v49, %v4041_v48  ;;  %v1050_v62 = vrot.slane %v1036_v50, %v4041_v48 }
 0x467   : > { %v1059_v55 = vrot.slane %v1051_v45, %v4041_v48  ;;  %v1066_v56 = vrot.slane %v1052_v46, %v4041_v48  ;;  %v1143_v57 = vrot.slane %v1129_v47, %v4031_v36  ;;  %v898_v46 = vand.u32 127, %v895_v29 }
 0x468   : > { %v1071_v11 = vcombine.low %v1043_v61, %v1050_v62  ;;  %v2367_v12 = vcombine.high %v1043_v61, %v1050_v62  ;;  %v900_v47 = vstv %s894_s6 }
 0x469   : > { %v1087_v4 = vcombine.low %v1059_v55, %v1066_v56  ;;  %v2368_v5 = vcombine.high %v1059_v55, %v1066_v56  ;;  %vm899_vm4 = vcmp.le.s32.totalorder %v898_v46, %v4024_v32  ;;  %vm901_vm5 = vcmp.lt.s32.totalorder %v898_v46, %v900_v47 }
 0x46a   : > { %v1078_v22 = vrot.slane %v1071_v11, %v4031_v36  ;;  %v1086_v23 = vrot.slane %v2367_v12, %v4031_v36  ;;  %vm902_vm6 = vmor %vm899_vm4, %vm901_vm5 }
 0x46b   : > { %v1094_v17 = vrot.slane %v1087_v4, %v4031_v36  ;;  %v1102_v18 = vrot.slane %v2368_v5, %v4031_v36 }
 0x46c   : > { %v1103_v31 = vcombine.low %v1078_v22, %v1086_v23 }
 0x46d   : > { %v1111_v30 = vcombine.low %v1094_v17, %v1102_v18 }
 0x46e   : > { %v1110_v38 = vrot.slane %v1103_v31, %v4041_v48 }
 0x46f   : > { %v1118_v35 = vrot.slane %v1111_v30, %v4041_v48 }
 0x471   : > { %v1119_v40 = vcombine.low %v1110_v38, %v1118_v35  ;;  %v1120_v44 = vcombine.high %v1110_v38, %v1118_v35 }
 0x473   : > { %v1121_v42 = vpack.c.bf16 %v1119_v40, %v1119_v40  ;;  %v1122_v45 = vpack.c.bf16 %v1120_v44, %v1120_v44 }
 0x4d3   : > { %v1126_v51 = vpop.permute.xlu0 %1125 }
 0x4d4   : > { %v1144_v53 = vcombine.high %v1126_v51, %v3253_v10  ;;  %v1151_v54 = vrot.slane %v1126_v51, %v4031_v36 }
 0x4d6   : > { %v1158_v58 = vrot.slane %v1144_v53, %v4031_v36  ;;  %v1159_v59 = vcombine.low %v1136_v52, %v1151_v54  ;;  %v1160_v60 = vcombine.high %v1136_v52, %v1151_v54 }
 0x4d8   : > { %v1167_v63 = vrot.slane %v1159_v59, %v4041_v48  ;;  %v1174_v0 = vrot.slane %v1160_v60, %v4041_v48  ;;  %v1175_v1 = vcombine.low %v1143_v57, %v1158_v58  ;;  %v1176_v3 = vcombine.high %v1143_v57, %v1158_v58 }
 0x4da   : > { %v1183_v6 = vrot.slane %v1175_v1, %v4041_v48  ;;  %v1190_v7 = vrot.slane %v1176_v3, %v4041_v48  ;;  %v1195_v8 = vcombine.low %v1167_v63, %v1174_v0  ;;  %v2369_v9 = vcombine.high %v1167_v63, %v1174_v0 }
 0x4dc   : > { %v1202_v13 = vrot.slane %v1195_v8, %v4031_v36  ;;  %v1210_v14 = vrot.slane %v2369_v9, %v4031_v36  ;;  %v1211_v15 = vcombine.low %v1183_v6, %v1190_v7  ;;  %v2370_v16 = vcombine.high %v1183_v6, %v1190_v7 }
 0x4de   : > { %v1218_v19 = vrot.slane %v1211_v15, %v4031_v36  ;;  %v1226_v20 = vrot.slane %v2370_v16, %v4031_v36  ;;  %v1227_v21 = vcombine.low %v1202_v13, %v1210_v14 }
 0x4e0   : > { %v1235_v25 = vcombine.low %v1218_v19, %v1226_v20  ;;  %v1234_v26 = vrot.slane %v1227_v21, %v4041_v48 }
 0x4e2   : > { %v1242_v27 = vrot.slane %v1235_v25, %v4041_v48 }
 0x4e4   : > { %v1243_v33 = vcombine.low %v1234_v26, %v1242_v27  ;;  %v1244_v39 = vcombine.high %v1234_v26, %v1242_v27 }
 0x4e6   : > { %v1245_v34 = vpack.c.bf16 %v1243_v33, %v1243_v33  ;;  %v1246_v41 = vpack.c.bf16 %v1244_v39, %v1244_v39 }
 0x4e8   : > { %v1376_v37 = vsel %vm1371_vm3, %v1245_v34, 0  ;;  %v1422_v43 = vsel %vm1371_vm3, %v1246_v41, 0 }
 0x4e9   : > { %2441 = vmatpush3.bf16.xpose.msra.mxu0 %v1376_v37 }
 0x4ea   : > { %2446 = vmatprep.subr.bf16.mxu0 %v3253_v10 }
 0x4f0   : > { %2443 = vmatmul.mubr.msk.bf16.vlgmr.msra.gmra.mrb[4].mxu0 %vm1371_vm3, %v1121_v42 }
 0x4f1   : > { %2447 = vmatpush3.bf16.xpose.msra.mxu0 %v1422_v43  ;;  %2448 = vmatprep.mubr.msk.bf16.mxu0 %vm3254_vm2, %v3253_v10 }
 0x4f2   : > { %2458 = vmatprep.subr.bf16.mxu0 %v3253_v10 }
 0x4f8   : > { %2449 = vmatmul.mubr.msk.bf16.vlgmr.msra.gmra.mrb[8].mxu0 %vm1371_vm3, %v1122_v45 }
 0x4f9   : > { %2460 = vmatprep.mubr.msk.bf16.mxu0 %vm3254_vm2, %v3253_v10 }
 0x5c3   : > { %v1412_v49 = vpop.f32.mrb[4].mxu0 }
 0x5c4   : > { %v1464_v50 = vmul.f32 0.25, %v1412_v49  ;;  %v2444_v51 = vpop.f32.mrb[5].mxu0 }
 0x5c5   : > { %v1415_v52 = vpop.f32.mrb[6].mxu0 }
 0x5c6   : > { %v2445_v53 = vpop.f32.mrb[7].mxu0  ;;  %v1468_v54 = vsel %vm902_vm6, %v1464_v50, -10000.0 }
 0x5c7   : > { %v1471_v55 = vsel %vm1470_vm7, %v1468_v54, -inf }
 0x5c8   : > { %1472 = vmax.xlane.f32.xlu1 %v1471_v55  ;;  %v2674_v55 = vld [vmem:[%s731_s7] sm:$0xff]  }
 0x5cb   : > { %v1458_v56 = vpop.f32.mrb[8].mxu0 }
 0x5cc   : > { %v1465_v57 = vmul.f32 0.25, %v1458_v56  ;;  %v2450_v58 = vpop.f32.mrb[9].mxu0 }
 0x5cd   : > { %v1461_v59 = vpop.f32.mrb[10].mxu0 }
 0x5ce   : > { %v2451_v29 = vpop.f32.mrb[11].mxu0  ;;  %v1469_v60 = vsel %vm902_vm6, %v1465_v57, -10000.0 }
 0x5cf   : > { %v1474_v32 = vsel %vm1470_vm7, %v1469_v60, -inf }
 0x5d0   : > { %1475 = vmax.xlane.f32.xlu0 %v1474_v32 }
 0x5e6   : > { %1249 = vrot.lane.b32.xlu0 %v4020_v28, %s3259_s25 }
 0x655   : > { %v1473_v61 = vpop.xlane.xlu1 %1472 }
 0x656   : > { %v1477_v62 = vsub.f32 %v1468_v54, %v1473_v61 }
 0x658   : > { %v1479_v63 = vmul.f32 1.442695, %v1477_v62 }
 0x65a   : > { %2688 = vpow2.f32 %v1479_v63 }
 0x65d   : > { %v1476_v0 = vpop.xlane.xlu0 %1475 }
 0x65e   : > { %v1478_v1 = vsub.f32 %v1469_v60, %v1476_v0 }
 0x660   : > { %v1481_v3 = vmul.f32 1.442695, %v1478_v1 }
 0x661   : > { %v1250_v28 = vpop.permute.xlu0 %1249 }
 0x662   : > { %2690 = vpow2.f32 %v1481_v3  ;;  %v1268_v11 = vcombine.high %v1250_v28, %v3253_v10  ;;  %v1275_v13 = vrot.slane %v1250_v28, %v4031_v36 }
 0x664   : > { %v2689_v4 = vpop.eup %2688  ;;  %v1282_v16 = vrot.slane %v1268_v11, %v4031_v36  ;;  %v2675_v11 = vld [vmem:[%s731_s7 + $0x8] sm:$0xff]  }
 0x665   : > { %v1483_v5 = vsel %vm1470_vm7, %v2689_v4, 0.0 }
 0x666   : > { %1484 = vadd.xlane.f32.xlu1 %v1483_v5 }
 0x66c   : > { %v2691_v6 = vpop.eup %2690 }
 0x66d   : > { %v1486_v7 = vsel %vm1470_vm7, %v2691_v6, 0.0 }
 0x66e   : > { %1487 = vadd.xlane.f32.xlu1 %v1486_v7 }
 0x67f   : > { %1247 = vrot.lane.b32.xlu1 %v4016_v24, %s3259_s25 }
 0x6f3   : > { %v1485_v8 = vpop.xlane.xlu1 %1484 }
 0x6f4   : > { %2692 = vrcp.f32 %v1485_v8 }
 0x6fb   : > { %v1488_v9 = vpop.xlane.xlu1 %1487 }
 0x6fc   : > { %2694 = vrcp.f32 %v1488_v9 }
 0x6fe   : > { %v2693_v40 = vpop.eup %2692 }
 0x6ff   : > { %v1248_v12 = vpop.permute.xlu1 %1247  ;;  %v1491_v50 = vmul.f32 %v2693_v40, %v2689_v4 }
 0x700   : > { %v1253_v14 = vcombine.high %v1248_v12, %v3253_v10  ;;  %v1260_v15 = vrot.slane %v1248_v12, %v4031_v36 }
 0x701   : > { %v1493_v53 = vpack.c.bf16 %v1491_v50, %v1491_v50 }
 0x702   : > { %v1267_v17 = vrot.slane %v1253_v14, %v4031_v36  ;;  %v1283_v18 = vcombine.low %v1260_v15, %v1275_v13  ;;  %v1284_v19 = vcombine.high %v1260_v15, %v1275_v13 }
 0x704   : > { %v1291_v24 = vrot.slane %v1283_v18, %v4041_v48  ;;  %v1298_v20 = vrot.slane %v1284_v19, %v4041_v48  ;;  %v1299_v21 = vcombine.low %v1267_v17, %v1282_v16  ;;  %v1300_v22 = vcombine.high %v1267_v17, %v1282_v16 }
 0x706   : > { %v1307_v23 = vrot.slane %v1299_v21, %v4041_v48  ;;  %v1314_v25 = vrot.slane %v1300_v22, %v4041_v48  ;;  %v1319_v26 = vcombine.low %v1291_v24, %v1298_v20  ;;  %v2371_v27 = vcombine.high %v1291_v24, %v1298_v20  ;;  %v2695_v43 = vpop.eup %2694 }
 0x707   : > { %v1492_v46 = vmul.f32 %v2695_v43, %v2691_v6 }
 0x708   : > { %v1335_v30 = vcombine.low %v1307_v23, %v1314_v25  ;;  %v2372_v31 = vcombine.high %v1307_v23, %v1314_v25  ;;  %v1326_v33 = vrot.slane %v1319_v26, %v4031_v36  ;;  %v1334_v34 = vrot.slane %v2371_v27, %v4031_v36 }
 0x709   : > { %v1494_v54 = vpack.c.bf16 %v1492_v46, %v1492_v46  ;;  %v2676_v46 = vld [vmem:[%s764_s27] sm:$0xff]  }
 0x70a   : > { %v1342_v35 = vrot.slane %v1335_v30, %v4031_v36  ;;  %v1350_v37 = vrot.slane %v2372_v31, %v4031_v36  ;;  %v1351_v38 = vcombine.low %v1326_v33, %v1334_v34 }
 0x70c   : > { %v1359_v39 = vcombine.low %v1342_v35, %v1350_v37  ;;  %v1358_v41 = vrot.slane %v1351_v38, %v4041_v48 }
 0x70e   : > { %v1366_v42 = vrot.slane %v1359_v39, %v4041_v48 }
 0x710   : > { %v1367_v44 = vcombine.low %v1358_v41, %v1366_v42  ;;  %v1368_v45 = vcombine.high %v1358_v41, %v1366_v42 }
 0x712   : > { %v1369_v47 = vpack.c.bf16 %v1367_v44, %v1367_v44  ;;  %v1370_v49 = vpack.c.bf16 %v1368_v45, %v1368_v45 }
 0x714   : > { %v1500_v51 = vsel %vm1498_vm8, %v1369_v47, 0  ;;  %v1546_v52 = vsel %vm1498_vm8, %v1370_v49, 0  ;;  %v2678_v47 = vld [vmem:[%s3974_s8] sm:$0xff]  }
 0x715   : > { %2453 = vmatpush3.bf16.msra.mxu1 %v1500_v51  ;;  %2459 = vmatpush3.bf16.msra.mxu0 %v1546_v52 }
 0x716   : > { %2464 = vmatprep.subr.bf16.mxu1 %v3253_v10  ;;  %2472 = vmatprep.subr.bf16.mxu0 %v3253_v10 }
 0x718   : > { %2455 = vmatmul.mubr.msk.bf16.vlgmr.msra.gmra.mrb[0].mxu1 %vm1470_vm7, %v1493_v53  ;;  %2461 = vmatmul.mubr.msk.bf16.vlgmr.msra.gmra.mrb[12].mxu0 %vm1470_vm7, %v1494_v54  ;;  %v2383_v53 = vld [vmem:[%s747_s22] ss:$0 sm:$0xff] }
 0x719   : > { %2468 = vmatprep.mubr.msk.bf16.mxu1 %vm3254_vm2, %v3253_v10  ;;  %2476 = vmatprep.mubr.msk.bf16.mxu0 %vm3254_vm2, %v3253_v10 }
 0x71a   : > { %2465 = vmatpush3.bf16.msra.mxu1 %v2674_v55  ;;  %2473 = vmatpush3.bf16.msra.mxu0 %v2676_v46  ;;  %v2384_v55 = vld [vmem:[%s755_s10] ss:$0 sm:$0xff] }
 0x71b   : > { %2466 = vmatprep.subr.bf16.mxu1 %v3253_v10  ;;  %2474 = vmatprep.subr.bf16.mxu0 %v3253_v10 }
 0x71e   : > { %2467 = vmatpush3.bf16.msra.mxu1 %v2675_v11 }
 0x71f   : > { %2480 = vmatprep.subr.bf16.mxu1 %v3253_v10 }
 0x7eb   : > { %v1536_v56 = vpop.f32.mrb[0].mxu1  ;;  %v1582_v57 = vpop.f32.mrb[12].mxu0 }
 0x7ec   : > { %v1588_v58 = vcombine.high %v1536_v56, %v3253_v10  ;;  %v1595_v59 = vrot.slane %v1536_v56, %v4031_v36  ;;  %v1603_v29 = vcombine.high %v1582_v57, %v3253_v10  ;;  %v1610_v60 = vrot.slane %v1582_v57, %v4031_v36  ;;  %v2456_v32 = vpop.f32.mrb[1].mxu1  ;;  %v2462_v61 = vpop.f32.mrb[13].mxu0 }
 0x7ed   : > { %v1539_v62 = vpop.f32.mrb[2].mxu1  ;;  %v1585_v63 = vpop.f32.mrb[14].mxu0  ;;  %v2682_v32 = vld [vmem:[%s3974_s8 + $0x20] sm:$0xff]   ;;  %v2683_v61 = vld [vmem:[%s3974_s8 + $0x28] sm:$0xff]  }
 0x7ee   : > { %v1602_v0 = vrot.slane %v1588_v58, %v4031_v36  ;;  %v1617_v1 = vrot.slane %v1603_v29, %v4031_v36  ;;  %v1618_v3 = vcombine.low %v1595_v59, %v1610_v60  ;;  %v1619_v4 = vcombine.high %v1595_v59, %v1610_v60  ;;  %v2457_v5 = vpop.f32.mrb[3].mxu1  ;;  %v2463_v6 = vpop.f32.mrb[15].mxu0  ;;  %v2679_v59 = vld [vmem:[%s3974_s8 + $0x8] sm:$0xff]   ;;  %v2680_v29 = vld [vmem:[%s3974_s8 + $0x10] sm:$0xff]   ;;  %v2681_v60 = vld [vmem:[%s3974_s8 + $0x18] sm:$0xff]  }
 0x7ef   : > { %v2684_v62 = vld [vmem:[%s3974_s8 + $0x30] sm:$0xff]   ;;  %v2685_v63 = vld [vmem:[%s3974_s8 + $0x38] sm:$0xff]  }
 0x7f0   : > { %v1626_v7 = vrot.slane %v1618_v3, %v4041_v48  ;;  %v1633_v8 = vrot.slane %v1619_v4, %v4041_v48  ;;  %v1634_v28 = vcombine.low %v1602_v0, %v1617_v1  ;;  %v1635_v9 = vcombine.high %v1602_v0, %v1617_v1  ;;  %v2385_v0 = vld [vmem:[%s772_s3] ss:$0 sm:$0xff] }
 0x7f2   : > { %v1642_v12 = vrot.slane %v1634_v28, %v4041_v48  ;;  %v1649_v13 = vrot.slane %v1635_v9, %v4041_v48  ;;  %v1654_v14 = vcombine.low %v1626_v7, %v1633_v8  ;;  %v2377_v15 = vcombine.high %v1626_v7, %v1633_v8 }
 0x7f4   : > { %v1661_v16 = vrot.slane %v1654_v14, %v4031_v36  ;;  %v1669_v17 = vrot.slane %v2377_v15, %v4031_v36  ;;  %v1670_v18 = vcombine.low %v1642_v12, %v1649_v13  ;;  %v2378_v19 = vcombine.high %v1642_v12, %v1649_v13 }
 0x7f6   : > { %v1677_v24 = vrot.slane %v1670_v18, %v4031_v36  ;;  %v1685_v20 = vrot.slane %v2378_v19, %v4031_v36  ;;  %v1686_v21 = vcombine.low %v1661_v16, %v1669_v17  ;;  %v2379_v36 = vld [vmem:[%s739_s0] ss:$0 sm:$0xff]  ;;  %s4374_s0 = sld [smem:[#allocation59_spill]] }
 0x7f7   : > { %v2389_v16 = vld [vmem:[%s789_s23] ss:$0 sm:$0xff] }
 0x7f8   : > { %v1694_v22 = vcombine.low %v1677_v24, %v1685_v20  ;;  %v1693_v23 = vrot.slane %v1686_v21, %v4041_v48 }
 0x7fa   : > { %v1701_v25 = vrot.slane %v1694_v22, %v4041_v48 }
 0x7fc   : > { %v1703_v26 = vcombine.high %v1693_v23, %v1701_v25  ;;  %v1702_v27 = vcombine.low %v1693_v23, %v1701_v25  ;;  %s4375_s10 = smov %s4374_s0  ;;  %s4180_s22 = scalar_lea.hbm %s4374_s0, %s2399_s21 }
 0x7fe   : > { %1705 = vrot.lane.b32.xlu1 %v1703_v26, %s3260_s19 }
 0x870   : > { %v1706_v30 = vpop.permute.xlu1 %1705 }
 0x871   : > { %v1708_v31 = vsel %vm1371_vm3, %v1702_v27, %v1706_v30 }
 0x872   : > { %v1709_v33 = vpack.c.bf16 %v1708_v31, %v1708_v31 }
 0x874   : > { %2469 = vmatmul.mubr.msk.bf16.vlgmr.msra.gmra.mrb[4].mxu1 %vm905_vm1, %v1709_v33 }
 0x875   : > { %2496 = vmatprep.mubr.msk.bf16.mxu1 %vm3254_vm2, %v3253_v10  ;;  %2481 = vmatpush3.bf16.msra.mxu1 %v2678_v47 }
 0x876   : > { %2482 = vmatprep.subr.bf16.mxu1 %v3253_v10 }
 0x879   : > { %2483 = vmatpush3.bf16.msra.mxu1 %v2679_v59 }
 0x87a   : > { %2484 = vmatprep.subr.bf16.mxu1 %v3253_v10 }
 0x87d   : > { %2485 = vmatpush3.bf16.msra.mxu1 %v2680_v29 }
 0x87e   : > { %2486 = vmatprep.subr.bf16.mxu1 %v3253_v10 }
 0x881   : > { %2487 = vmatpush3.bf16.msra.mxu1 %v2681_v60 }
 0x882   : > { %2488 = vmatprep.subr.bf16.mxu1 %v3253_v10 }
 0x885   : > { %2489 = vmatpush3.bf16.msra.mxu1 %v2682_v32 }
 0x886   : > { %2490 = vmatprep.subr.bf16.mxu1 %v3253_v10 }
 0x889   : > { %2491 = vmatpush3.bf16.msra.mxu1 %v2683_v61 }
 0x88a   : > { %2492 = vmatprep.subr.bf16.mxu1 %v3253_v10 }
 0x88d   : > { %2493 = vmatpush3.bf16.msra.mxu1 %v2684_v62 }
 0x88e   : > { %2494 = vmatprep.subr.bf16.mxu1 %v3253_v10 }
 0x891   : > { %2495 = vmatpush3.bf16.msra.mxu1 %v2685_v63 }
 0x947   : > { %v1770_v34 = vpop.f32.mrb[4].mxu1 }
 0x948   : > { %v1771_v35 = vadd.f32 %v2379_v36, %v1770_v34  ;;  %v2470_v48 = vpop.f32.mrb[5].mxu1 }
 0x949   : > { %v1773_v37 = vpop.f32.mrb[6].mxu1 }
 0x94a   : > { %v4139_v38 = vadd.f32 %v1771_v35, %v3989_v2  ;;  %v2471_v39 = vpop.f32.mrb[7].mxu1  ;;  %v2677_v2 = vld [vmem:[%s764_s27 + $0x8] sm:$0xff]   ;;  %s3261_s27 = smov [#allocation25]  }
 0x94b   : > { %2475 = vmatpush3.bf16.msra.mxu0 %v2677_v2  ;;  %s3094_s2 = sshll.u32 %s3261_s27, 4  ;;  %s3095_s2 = int_to_ptr.vmem [resolvable:$false] %s3094_s2 }
 0x94c   : > { %v1779_v40 = vsel %vm905_vm1, %v4139_v38, 0.0  ;;  %s3096_s3 = scalar_lea.vmem %s3095_s2, 128  ;;  %p3097_p2 = scmp.lt.s32.totalorder %s4182_s16, %s3095_s2 }
 0x94d   : > { %1780 = vadd.xlane.f32.xlu1 %v1779_v40  ;;  %p3098_p6 = scmp.lt.s32.totalorder %s3096_s3, %s3090_s1 }
 0x94f   : > { %p3099_p10 = por %p3098_p6, %p3097_p2 }
 0x951   : > { %p3100_p12 = pnand %p3099_p10, %p3093_p11 }
 0x9da   : > { %v1781_v41 = vpop.xlane.xlu1 %1780 }
 0x9db   : > { %v1782_v42 = vmul.f32 0.03125, %v1781_v41 }
 0x9dd   : > { %v1783_v43 = vsub.f32 %v4139_v38, %v1782_v42 }
 0x9df   : > { %v1784_v44 = vmul.f32 %v1783_v43, %v1783_v43 }
 0x9e1   : > { %v1785_v45 = vsel %vm905_vm1, %v1784_v44, 0.0 }
 0x9e2   : > { %1786 = vadd.xlane.f32.xlu0 %v1785_v45 }
 0xa6f   : > { %v1787_v49 = vpop.xlane.xlu0 %1786 }
 0xa70   : > { %v1788_v50 = vmul.f32 0.03125, %v1787_v49 }
 0xa72   : > { %v1789_v51 = vadd.f32 1e-05, %v1788_v50 }
 0xa74   : > { %2696 = vrsqrt.f32 %v1789_v51 }
 0xa7e   : > { %v2697_v52 = vpop.eup %2696 }
 0xa7f   : > { %v1791_v54 = vmul.f32 %v2697_v52, %v1783_v43 }
 0xa81   : > { %v1798_v56 = vmul.f32 %v2383_v53, %v1791_v54 }
 0xa83   : > { %v1805_v57 = vadd.f32 %v2384_v55, %v1798_v56 }
 0xa85   : > { %v1806_v58 = vpack.c.bf16 %v1805_v57, %v1805_v57 }
 0xa87   : > { %2477 = vmatmul.mubr.msk.bf16.vlgmr.msra.gmra.mrb[16].mxu0 %vm905_vm1, %v1806_v58 }
 0xb5a   : > { %v1867_v1 = vpop.f32.mrb[16].mxu0 }
 0xb5b   : > { %v1868_v3 = vadd.f32 %v2385_v0, %v1867_v1  ;;  %v2478_v4 = vpop.f32.mrb[17].mxu0 }
 0xb5c   : > { %v1870_v5 = vpop.f32.mrb[18].mxu0 }
 0xb5d   : > { %v1875_v6 = vmul.f32 0.044715, %v1868_v3  ;;  %v2479_v7 = vpop.f32.mrb[19].mxu0  ;;  %v1874_v28 = vmul.f32 0.7978846, %v1868_v3  ;;  %v1873_v13 = vmul.f32 0.5, %v1868_v3 }
 0xb5f   : > { %v1876_v8 = vmul.f32 %v1875_v6, %v1868_v3 }
 0xb61   : > { %v1877_v9 = vadd.f32 1.0, %v1876_v8 }
 0xb63   : > { %v1878_v11 = vmul.f32 %v1877_v9, %v1874_v28 }
 0xb65   : > { %2698 = vtanh.f32 %v1878_v11 }
 0xb6f   : > { %v2699_v12 = vpop.eup %2698 }
 0xb70   : > { %v1880_v10 = vadd.f32 1.0, %v2699_v12 }
 0xb72   : > { %v1881_v14 = vmul.f32 %v1880_v10, %v1873_v13 }
 0xb74   : > { %v1882_v15 = vpack.c.bf16 %v1881_v14, %v1881_v14 }
 0xb76   : > { %2497 = vmatmul.mubr.bf16.vlgmr.msra.gmra.mrb[8].mxu1 %v1882_v15 }
 0xc49   : > { %v1988_v17 = vpop.f32.mrb[8].mxu1 }
 0xc4a   : > { %v1989_v18 = vadd.f32 %v2389_v16, %v1988_v17  ;;  %v2498_v19 = vpop.f32.mrb[9].mxu1 }
 0xc4b   : > { %v1991_v24 = vpop.f32.mrb[10].mxu1 }
 0xc4c   : > { %v1994_v20 = vadd.f32 %v1989_v18, %v4139_v38  ;;  %v2499_v21 = vpop.f32.mrb[11].mxu1 }
 0xc4e   : > { %v1995_v22 = vpack.c.bf16 %v1994_v20, %v1994_v20 }
 0xc50   : > { %1997 = vst.msk [vmem:[%s3983_s5] sm:$0xf] %vm1996_vm9, %v1995_v22 }
 0xc51   : > { %3103 = shalt.err (!%p3100_p12)
}
 0xc52   : > { %s3104_s29 = scalar_lea.hbm %s4180_s22, 64  ;;  %s3108_s23 = scalar_lea.hbm %s4375_s10, 128 }
 0xc53   : > { %p3105_p5 = scmp.ne.s32.totalorder %s4180_s22, %s3104_s29  ;;  %p3109_p8 = scmp.lt.u32.totalorder %s4180_s22, %s4375_s10 }
 0xc54   : > { %p3110_p13 = scmp.lt.u32.totalorder %s3108_s23, %s3104_s29  ;;  %p3112_p1 = scmp.lt.u32.totalorder %s3104_s29, %s4180_s22 }
 0xc55   : > { %p3106_p7 = pnand %p3105_p5, %p4376_p4 }
 0xc56   : > { %p3111_p9 = por %p3110_p13, %p3109_p8 }
 0xc57   : > { %p3107_p0 = pneg %p3106_p7 }
 0xc58   : > { %p3113_p3 = por %p3112_p1, %p3111_p9 }
 0xc5a   : > { %p3114_p11 = pnand %p3113_p3, %p3107_p0 }
 0xc5c   : > { %3117 = shalt.err (!%p3114_p11)
}
 0xc5d   : > { %2526 = dma.vmem_to_hbm [thread:$0]  (%p4376_p4), %s4182_s16, 64, %s4180_s22, %s1999_s15  }
 0xc5e PF: > { %p2573_p2 = scmp.ge.s32.totalorder %s3236_s24, 2  ;;  %s2024_s14 = sand.u32 1, %s3208_s17  }
 0xc5f   : > { %p4377_p6 = scmp.ne.s32.totalorder %s4341_s9, 0  ;;  %s2025_s13 = scalar_lea.sflag [#allocation6], %s2024_s14 }
 0xc61   : > { %p2569_p10 = pnand %p2573_p2, %p4377_p6 }
 0xc63   : > { %3191 = dma.done.wait (!%p2569_p10), %s2025_s13, 64  }
 0xc64   : > { %3193 = vsyncadd (!%p2569_p10), %s2025_s13, 4294967232  ;;  %s49_s24 = sadd.s32 1, %s3236_s24   ;;  %s4378_s15 = sld [smem:[#allocation34_spill]] }
 0xc65   : > { %p46_p12 = scmp.ge.s32.totalorder %s49_s24, 6   ;;  %s4379_s16 = sld [smem:[#allocation35_spill]] }
 0xc66   : > { %s4380_s0 = sld [smem:[#allocation44_spill]]  ;;  %s4381_s30 = sld [smem:[#allocation36_spill]] }
 0xc67   : > { %s4382_s19 = sld [smem:[#allocation45_spill]]  ;;  %s4383_s20 = sld [smem:[#allocation39_spill]] }
 0xc68   : > { %s4384_s21 = sld [smem:[#allocation40_spill]]  ;;  %s4385_s22 = sld [smem:[#allocation42_spill]] }
 0xc69   : > { %s4386_s23 = sld [smem:[#allocation43_spill]]  ;;  %s4387_s17 = smov %s3212_s18 }
 0xc6a   :  { %48 = sbr.rel (!%p46_p12) target bundleno = 37 (0x25), region = 265 }
 0xc6c   : > { %s4388_s18 = smov %s4381_s30 }
 0xc71   :  { %2030 = vsyncpa [#allocation5], 1 }
 0xc72   :  { %2032 = vsyncpa [#allocation5 + $0x1], 1 }
 0xc73   :  { %2033 = vsyncpa [#allocation8], 1 }
 0xc74   :  { %2035 = vsyncpa [#allocation8 + $0x1], 1 }
 0xc75   :  { %2036 = vsyncpa [#allocation11], 1 }
 0xc76   :  { %2038 = vsyncpa [#allocation11 + $0x1], 1 }
 0xc77   :  { %2039 = vsyncpa [#allocation14], 1 }
 0xc78   :  { %2041 = vsyncpa [#allocation14 + $0x1], 1 }
 0xc79   :  { %2042 = vsyncpa [#allocation17], 1 }
 0xc7a   :  { %2044 = vsyncpa [#allocation17 + $0x1], 1 }
 0xc7b   :  { %2045 = vsyncpa [#allocation20], 1 }
 0xc7c   :  { %2047 = vsyncpa [#allocation20 + $0x1], 1 }
 0xc7d   :  { %2048 = vsyncpa [#allocation23], 1 }
 0xc7e   :  { %2050 = vsyncpa [#allocation23 + $0x1], 1 }
 0xc7f   :  { %2051 = vsyncpa [#allocation6], 1 }
 0xc80   :  { %2053 = vsyncpa [#allocation6 + $0x1], 1 }

</bundles_post_ra>
